<compile_context>
chip_gen: v6e
topology: v6e:2x2x1
jax: 0.10.0
libtpu: 0.0.40
codegen_flags: <defaults>
</compile_context>

<pallas_src>
import functools
import math

import jax
import jax.numpy as jnp
import numpy as np
from jax import lax
from jax.experimental import pallas as pl
from jax.experimental.pallas import tpu as pltpu


# ------------------------ device-generation tuning ------------------------- #

def _tpu_generation():
    try:
        kind = jax.devices()[0].device_kind.lower()
    except Exception:
        return 0
    if "v7" in kind or "7x" in kind:
        return 7
    if "v6" in kind:
        return 6
    if "v5" in kind:
        return 5
    if "v4" in kind:
        return 4
    return 0


_GEN = _tpu_generation()
# bf16 EUP exists on v6e/v7x only; keep the softmax exp in f32 elsewhere.
_EXP_BF16 = _GEN >= 6
# Smaller score tiles on v7x (64 MiB physical VMEM).
_KV_BLK_CAP = 256 if _GEN >= 7 else 512


def _vmem_limit_bytes():
    if _GEN >= 7:
        return 48 << 20        # v7x: 64 MiB physical
    if _GEN in (5, 6):
        return 96 << 20        # v5e/v6e: 128 MiB physical, small default scoped limit
    return None


# --------------------------------- kernel ---------------------------------- #

def attn_prop_kernel(
    src_ref,                           # scalar-prefetch role table (used by index_maps only)
    x_ref, s_ref,
    wq_ref, bq_ref, wkv_ref, bkv_ref,
    wm_ref, bm_ref, w1x_ref, w1m_ref, b1_ref, w2_ref, b2_ref,
    out_ref,
    kv_scr, o_scr,
    *, num_heads, head_dim, kv_blk, exp_bf16,
):
    """One AttentionalPropagation step + residual for one (batch, role) slab."""
    del src_ref
    f32, bf16 = jnp.float32, jnp.bfloat16

    x = x_ref[...]                     # (N, D) f32
    N, D = x.shape
    x_bf = x.astype(bf16)
    s_bf = s_ref[...].astype(bf16)
    n_kv = N // kv_blk

    # ---- fused, lane-dense projections (scale folded into wq/bq on host) ----
    q_bf = (jnp.dot(x_bf, wq_ref[...], preferred_element_type=f32)
            + bq_ref[...]).astype(bf16)                        # (N, D)
    kv_scr[...] = (jnp.dot(s_bf, wkv_ref[...], preferred_element_type=f32)
                   + bkv_ref[...]).astype(bf16)                # (N, 2D): K | V

    # ---- per-head flash-style online softmax over KV chunks ----
    for h in range(num_heads):
        q_h = q_bf[:, h * head_dim:(h + 1) * head_dim]         # (N, hd) static slice
        k_off = h * head_dim
        v_off = D + h * head_dim

        def kv_step(c, carry, _k_off=k_off, _v_off=v_off, _q_h=q_h):
            m_i, l_i, acc = carry
            row = pl.multiple_of(c * kv_blk, kv_blk)
            kc = kv_scr[pl.ds(row, kv_blk), pl.ds(_k_off, head_dim)]
            vc = kv_scr[pl.ds(row, kv_blk), pl.ds(_v_off, head_dim)]
            sc = lax.dot_general(_q_h, kc, (((1,), (1,)), ((), ())),
                                 preferred_element_type=f32)   # (N, kv_blk)
            m_new = jnp.maximum(m_i, jnp.max(sc, axis=-1, keepdims=True))
            alpha = jnp.exp(m_i - m_new)
            shifted = sc - m_new
            if exp_bf16:                                       # v6e/v7x: bf16 EUP
                p_bf = jnp.exp(shifted.astype(bf16))
                p_f32 = p_bf.astype(f32)
            else:                                              # v5e/v4: f32 exp
                p_f32 = jnp.exp(shifted)
                p_bf = p_f32.astype(bf16)
            l_new = alpha * l_i + jnp.sum(p_f32, axis=-1, keepdims=True)
            acc_new = alpha * acc + jnp.dot(p_bf, vc, preferred_element_type=f32)
            return m_new, l_new, acc_new

        init = (jnp.full((N, 1), -jnp.inf, f32),
                jnp.zeros((N, 1), f32),
                jnp.zeros((N, head_dim), f32))
        m_i, l_i, acc = lax.fori_loop(0, n_kv, kv_step, init)

        # Stash this head's output at its lane offset; merged with ONE matmul below.
        o_scr[:, pl.ds(h * head_dim, head_dim)] = (
            acc * pl.reciprocal(l_i, approx=True)).astype(bf16)

    # ---- single full-K merge matmul ----
    msg = jnp.dot(o_scr[...], wm_ref[...],
                  preferred_element_type=f32) + bm_ref[...]    # (N, D) f32

    # ---- MLP([2D, 2D, D]) without materializing cat([x, message]) ----
    h1 = (jnp.dot(x_bf, w1x_ref[...], preferred_element_type=f32)
          + jnp.dot(msg.astype(bf16), w1m_ref[...], preferred_element_type=f32)
          + b1_ref[...])                                       # (N, 2D)

    # InstanceNorm1d (biased variance over N points), two-pass (centered) stats.
    inv_n = 1.0 / N
    mean = jnp.sum(h1, axis=0, keepdims=True) * inv_n
    h1c = h1 - mean
    var = jnp.sum(h1c * h1c, axis=0, keepdims=True) * inv_n
    h1n = jnp.maximum(h1c * lax.rsqrt(var + 1e-5), 0.0)

    delta = jnp.dot(h1n.astype(bf16), w2_ref[...],
                    preferred_element_type=f32) + b2_ref[...]  # (N, D)

    out_ref[...] = x + delta                                   # residual update


# ------------------------------ pallas wrapper ------------------------------ #

def attentional_propagation_call(x_bnd, src_idx, p, num_heads, *, alias_io):
    """x_bnd: (2B, N, D) channels-last; src_idx: (2B,) int32 role table."""
    Btot, N, D = x_bnd.shape
    head_dim = D // num_heads
    kv_blk = min(N, _KV_BLK_CAP)
    # TODO(synk): ragged N needs -inf masking of padded KV columns in the online softmax.
    assert N % kv_blk == 0

    def data_map(b, src):
        return (b, 0, 0)

    def src_map(b, src):
        return (src[b], 0, 0)              # 'self': identity, 'cross': peer slab

    data_spec = pl.BlockSpec((None, N, D), data_map)
    s_spec = pl.BlockSpec((None, N, D), src_map)

    def full_spec(a):
        nd = a.ndim
        idx = lambda b, src, _nd=nd: (0,) * _nd
        try:   # constant index_map -> single-buffer the weights (free VMEM headroom)
            return pl.BlockSpec(a.shape, idx, pipeline_mode=pl.Buffered(buffer_count=1))
        except (TypeError, AttributeError):
            return pl.BlockSpec(a.shape, idx)

    weights = (p["wq"], p["bq"], p["wkv"], p["bkv"], p["wm"], p["bm"],
               p["w1x"], p["w1m"], p["b1"], p["w2"], p["b2"])
    in_specs = [data_spec, s_spec] + [full_spec(a) for a in weights]

    kernel = functools.partial(attn_prop_kernel, num_heads=num_heads,
                               head_dim=head_dim, kv_blk=kv_blk,
                               exp_bf16=_EXP_BF16)

    grid_spec = pltpu.PrefetchScalarGridSpec(
        num_scalar_prefetch=1,
        grid=(Btot,),
        in_specs=in_specs,
        out_specs=data_spec,
        scratch_shapes=[pltpu.VMEM((N, 2 * D), jnp.bfloat16),   # K | V (bf16)
                        pltpu.VMEM((N, D), jnp.bfloat16)],      # per-head outputs
    )

    # In-place residual update: only safe for 'self' layers (identity role table);
    # 'cross' layers read peer slabs that an aliased output would overwrite
    # mid-layer.
    alias = {1: 0} if alias_io else {}

    # TODO(synk): at production N (~1-2k) add a query-row grid axis (128-256 rows,
    # "parallel") with InstanceNorm partials accumulated in scratch; N=8 here is
    # below the (8,128) block minimum so one slab per grid step is used.
    # TODO(synk): 'self' layers DMA the same slab twice (x and s operands);
    # acceptable since the kernel is compute-bound at production shapes.
    return pl.pallas_call(
        kernel,
        out_shape=jax.ShapeDtypeStruct((Btot, N, D), jnp.float32),
        grid_spec=grid_spec,
        compiler_params=pltpu.CompilerParams(
            dimension_semantics=("parallel",),
            vmem_limit_bytes=_vmem_limit_bytes()),
        input_output_aliases=alias,
    )(src_idx, x_bnd, x_bnd, *weights)


# -------------------------- host-side weight prep --------------------------- #

def prepare_params(raw, num_heads):
    """Permute / transpose / scale-fold / re-stack all Conv1d weights once at load time.

    PyTorch's `.view(B, dim, H, N)` maps Conv1d output channel c to (d, h) with
    c = d*H + h, so head h owns channels {d*H + h : d}. We re-order output lanes
    to be per-head contiguous so per-head slices are static lane windows.
    """
    D = raw["wm"].shape[0]
    dim = D // num_heads
    perm = np.array([d * num_heads + h
                     for h in range(num_heads) for d in range(dim)])
    scale = 1.0 / math.sqrt(dim)
    bf16, f32 = jnp.bfloat16, jnp.float32

    # Q: fused (D, D), score scale folded in.
    wq = (raw["wq"][perm, :] * scale).T.astype(bf16)
    bq = (raw["bq"][perm] * scale)[None, :].astype(f32)

    # K | V: fused (D, 2D).
    wk_t = raw["wk"][perm, :].T
    wv_t = raw["wv"][perm, :].T
    wkv = jnp.concatenate([wk_t, wv_t], axis=1).astype(bf16)
    bkv = jnp.concatenate([raw["bk"][perm], raw["bv"][perm]])[None, :].astype(f32)

    # Merge: message = o_concat @ wm  (o_concat lanes in per-head-contiguous order).
    wm = raw["wm"][:, perm].T.astype(bf16)                      # (D, D)
    bm = raw["bm"][None, :].astype(f32)

    # MLP first conv split into x-half and message-half (skips the concat).
    w1x = raw["w1"][:, :D].T.astype(bf16)                       # (D, 2D)
    w1m = raw["w1"][:, D:].T.astype(bf16)                       # (D, 2D)
    b1 = raw["b1"][None, :].astype(f32)
    w2 = raw["w2"].T.astype(bf16)                               # (2D, D)
    b2 = raw["b2"][None, :].astype(f32)

    return dict(wq=wq, bq=bq, wkv=wkv, bkv=bkv, wm=wm, bm=bm,
                w1x=w1x, w1m=w1m, b1=b1, w2=w2, b2=b2)


def attentional_gnn_forward(desc0, desc1, prepared_layers, layer_names, num_heads=4):
    """desc0, desc1: (B, D, N) as in the PyTorch module. prepared_layers: prepare_params output."""
    B = desc0.shape[0]
    # Fuse the desc0 / desc1 updates of each layer into one pallas_call by
    # stacking them along the batch axis (they share all weights).
    d = jnp.concatenate([jnp.transpose(desc0, (0, 2, 1)),
                         jnp.transpose(desc1, (0, 2, 1))], axis=0)   # (2B, N, D)
    idx_self = jnp.arange(2 * B, dtype=jnp.int32)
    idx_cross = jnp.concatenate([jnp.arange(B, 2 * B, dtype=jnp.int32),
                                 jnp.arange(0, B, dtype=jnp.int32)])
    for p, name in zip(prepared_layers, layer_names):
        is_cross = (name == "cross")
        src_idx = idx_cross if is_cross else idx_self
        d = attentional_propagation_call(d, src_idx, p, num_heads,
                                         alias_io=not is_cross)
    # TODO(synk): layer.attn.prob (attention probability bookkeeping) is not returned.
    out0 = jnp.transpose(d[:B], (0, 2, 1))
    out1 = jnp.transpose(d[B:], (0, 2, 1))
    return out0, out1


# ------------------------- parameter initialization ------------------------ #

def conv1d_init(key, out_c, in_c):
    kw, kb = jax.random.split(key)
    bound = 1.0 / math.sqrt(in_c)
    w = jax.random.uniform(kw, (out_c, in_c), jnp.float32, -bound, bound)
    b = jax.random.uniform(kb, (out_c,), jnp.float32, -bound, bound)
    return w, b


def init_layer_params(key, D):
    k1, k2, k3 = jax.random.split(key, 3)
    wm, bm = conv1d_init(k1, D, D)
    # deepcopy quirk in MultiHeadedAttention: q/k/v proj start as copies of merge
    raw = dict(wq=wm, bq=bm, wk=wm, bk=bm, wv=wm, bv=bm, wm=wm, bm=bm)
    w1, b1 = conv1d_init(k2, 2 * D, 2 * D)
    w2, _ = conv1d_init(k3, D, 2 * D)
    b2 = jnp.zeros((D,), jnp.float32)  # nn.init.constant_(mlp[-1].bias, 0.0)
    raw.update(w1=w1, b1=b1, w2=w2, b2=b2)
    return raw


# ----------------------------- pure-JAX reference -------------------------- #

def ref_attn_prop(x, s, raw, num_heads):
    B, D, N = x.shape
    dim = D // num_heads

    def conv1(w, b, t):
        return jnp.einsum("oi,bin->bon", w, t) + b[None, :, None]

    q = conv1(raw["wq"], raw["bq"], x).reshape(B, dim, num_heads, N)
    k = conv1(raw["wk"], raw["bk"], s).reshape(B, dim, num_heads, N)
    v = conv1(raw["wv"], raw["bv"], s).reshape(B, dim, num_heads, N)
    scores = jnp.einsum("bdhn,bdhm->bhnm", q, k) / math.sqrt(dim)
    prob = jax.nn.softmax(scores, axis=-1)
    o = jnp.einsum("bhnm,bdhm->bdhn", prob, v).reshape(B, D, N)
    message = conv1(raw["wm"], raw["bm"], o)
    cat = jnp.concatenate([x, message], axis=1)
    h1 = conv1(raw["w1"], raw["b1"], cat)
    mean = jnp.mean(h1, axis=-1, keepdims=True)
    var = jnp.mean((h1 - mean) ** 2, axis=-1, keepdims=True)
    h1 = jnp.maximum((h1 - mean) / jnp.sqrt(var + 1e-5), 0.0)
    return conv1(raw["w2"], raw["b2"], h1)


def ref_gnn(desc0, desc1, layer_params, layer_names, num_heads=4):
    for raw, name in zip(layer_params, layer_names):
        if name == "cross":
            s0, s1 = desc1, desc0
        else:
            s0, s1 = desc0, desc1
        d0 = desc0 + ref_attn_prop(desc0, s0, raw, num_heads)
        d1 = desc1 + ref_attn_prop(desc1, s1, raw, num_heads)
        desc0, desc1 = d0, d1
    return desc0, desc1


# ----------------------------------- main ----------------------------------- #

if __name__ == "__main__":
    B, D, N = 2, 32, 8          # batch, feature_dim, num points
    num_heads = 4
    layer_names = ["self", "cross"]

    key = jax.random.PRNGKey(0)
    kd0, kd1, kp = jax.random.split(key, 3)
    desc0 = jax.random.normal(kd0, (B, D, N), jnp.float32)
    desc1 = jax.random.normal(kd1, (B, D, N), jnp.float32)
    layer_keys = jax.random.split(kp, len(layer_names))
    layer_params = [init_layer_params(k, D) for k in layer_keys]

    # Host-side weight reshuffling runs once at "load time", outside the jitted forward.
    prepared = [prepare_params(raw, num_heads) for raw in layer_params]

    fwd = jax.jit(functools.partial(attentional_gnn_forward,
                                    layer_names=layer_names, num_heads=num_heads))
    out0, out1 = fwd(desc0, desc1, prepared)
    out0 = jax.block_until_ready(out0)
    out1 = jax.block_until_ready(out1)

    r0, r1 = ref_gnn(desc0, desc1, layer_params, layer_names, num_heads)

    def rel_err(a, b):
        return float(jnp.linalg.norm(a - b) / (jnp.linalg.norm(b) + 1e-12))

    # bf16 MXU inputs (f32 accumulation) + approx reciprocal (+ bf16 exp on v6e/v7x):
    # check relative-norm + loose elementwise tolerances.
    assert rel_err(out0, r0) < 2e-2, "desc0 mismatch"
    assert rel_err(out1, r1) < 2e-2, "desc1 mismatch"
    assert jnp.allclose(out0, r0, atol=5e-2, rtol=5e-2), "desc0 elementwise mismatch"
    assert jnp.allclose(out1, r1, atol=5e-2, rtol=5e-2), "desc1 elementwise mismatch"

    print("KERNEL_OK")
</pallas_src>

<mosaic_0001>
module attributes {stable_mosaic.version = 11 : i64} {
  func.func @attn_prop_kernel(%arg0: i32, %arg1: memref<4xi32, #tpu.memory_space<smem>>, %arg2: memref<1x8x32xf32, #tpu.memory_space<vmem>>, %arg3: memref<1x8x32xf32, #tpu.memory_space<vmem>>, %arg4: memref<32x32xbf16, #tpu.memory_space<vmem>>, %arg5: memref<1x32xf32, #tpu.memory_space<vmem>>, %arg6: memref<32x64xbf16, #tpu.memory_space<vmem>>, %arg7: memref<1x64xf32, #tpu.memory_space<vmem>>, %arg8: memref<32x32xbf16, #tpu.memory_space<vmem>>, %arg9: memref<1x32xf32, #tpu.memory_space<vmem>>, %arg10: memref<32x64xbf16, #tpu.memory_space<vmem>>, %arg11: memref<32x64xbf16, #tpu.memory_space<vmem>>, %arg12: memref<1x64xf32, #tpu.memory_space<vmem>>, %arg13: memref<64x32xbf16, #tpu.memory_space<vmem>>, %arg14: memref<1x32xf32, #tpu.memory_space<vmem>>, %arg15: memref<1x8x32xf32, #tpu.memory_space<vmem>>, %arg16: memref<8x64xbf16, #tpu.memory_space<vmem>>, %arg17: memref<8x32xbf16, #tpu.memory_space<vmem>>) attributes {dimension_semantics = [#tpu.dimension_semantics<parallel>], iteration_bounds = array<i64: 4>, scalar_prefetch = 1 : i64, scratch_operands = 2 : i64, tpu.core_type = #tpu.core_type<tc>, window_params = [{transform_indices = @transform_0, window_bounds = array<i64: 1, 8, 32>}, {transform_indices = @transform_1, window_bounds = array<i64: 1, 8, 32>}, {pipeline_mode = #tpu.pipeline_mode<synchronous>, transform_indices = @transform_2, window_bounds = array<i64: 32, 32>}, {pipeline_mode = #tpu.pipeline_mode<synchronous>, transform_indices = @transform_3, window_bounds = array<i64: 1, 32>}, {pipeline_mode = #tpu.pipeline_mode<synchronous>, transform_indices = @transform_4, window_bounds = array<i64: 32, 64>}, {pipeline_mode = #tpu.pipeline_mode<synchronous>, transform_indices = @transform_5, window_bounds = array<i64: 1, 64>}, {pipeline_mode = #tpu.pipeline_mode<synchronous>, transform_indices = @transform_6, window_bounds = array<i64: 32, 32>}, {pipeline_mode = #tpu.pipeline_mode<synchronous>, transform_indices = @transform_7, window_bounds = array<i64: 1, 32>}, {pipeline_mode = #tpu.pipeline_mode<synchronous>, transform_indices = @transform_8, window_bounds = array<i64: 32, 64>}, {pipeline_mode = #tpu.pipeline_mode<synchronous>, transform_indices = @transform_9, window_bounds = array<i64: 32, 64>}, {pipeline_mode = #tpu.pipeline_mode<synchronous>, transform_indices = @transform_10, window_bounds = array<i64: 1, 64>}, {pipeline_mode = #tpu.pipeline_mode<synchronous>, transform_indices = @transform_11, window_bounds = array<i64: 64, 32>}, {pipeline_mode = #tpu.pipeline_mode<synchronous>, transform_indices = @transform_12, window_bounds = array<i64: 1, 32>}, {transform_indices = @transform_13, window_bounds = array<i64: 1, 8, 32>}]} {
    %c0 = arith.constant 0 : index
    %c0_0 = arith.constant 0 : index
    %c0_1 = arith.constant 0 : index
    %0 = vector.load %arg2[%c0, %c0_0, %c0_1] : memref<1x8x32xf32, #tpu.memory_space<vmem>>, vector<1x8x32xf32>
    %1 = vector.shape_cast %0 : vector<1x8x32xf32> to vector<8x32xf32>
    %2 = arith.truncf %1 : vector<8x32xf32> to vector<8x32xbf16>
    %c0_2 = arith.constant 0 : index
    %c0_3 = arith.constant 0 : index
    %c0_4 = arith.constant 0 : index
    %3 = vector.load %arg3[%c0_2, %c0_3, %c0_4] : memref<1x8x32xf32, #tpu.memory_space<vmem>>, vector<1x8x32xf32>
    %4 = vector.shape_cast %3 : vector<1x8x32xf32> to vector<8x32xf32>
    %5 = arith.truncf %4 : vector<8x32xf32> to vector<8x32xbf16>
    %c0_5 = arith.constant 0 : index
    %c0_6 = arith.constant 0 : index
    %6 = vector.load %arg4[%c0_5, %c0_6] : memref<32x32xbf16, #tpu.memory_space<vmem>>, vector<32x32xbf16>
    %cst = arith.constant dense<0.000000e+00> : vector<8x32xf32>
    %7 = tpu.matmul %2, %6, %cst {dimension_numbers = #tpu.dot_dimension_numbers<[1], [0], [0], [1], [0, 0, 1, 1], [], []>} : vector<8x32xbf16>, vector<32x32xbf16>, vector<8x32xf32> -> vector<8x32xf32>
    %c0_7 = arith.constant 0 : index
    %c0_8 = arith.constant 0 : index
    %8 = vector.load %arg5[%c0_7, %c0_8] : memref<1x32xf32, #tpu.memory_space<vmem>>, vector<1x32xf32>
    %9 = vector.broadcast %8 : vector<1x32xf32> to vector<8x32xf32>
    %10 = arith.addf %7, %9 : vector<8x32xf32>
    %11 = arith.truncf %10 : vector<8x32xf32> to vector<8x32xbf16>
    %c0_9 = arith.constant 0 : index
    %c0_10 = arith.constant 0 : index
    %12 = vector.load %arg6[%c0_9, %c0_10] : memref<32x64xbf16, #tpu.memory_space<vmem>>, vector<32x64xbf16>
    %cst_11 = arith.constant dense<0.000000e+00> : vector<8x64xf32>
    %13 = tpu.matmul %5, %12, %cst_11 {dimension_numbers = #tpu.dot_dimension_numbers<[1], [0], [0], [1], [0, 0, 1, 1], [], []>} : vector<8x32xbf16>, vector<32x64xbf16>, vector<8x64xf32> -> vector<8x64xf32>
    %c0_12 = arith.constant 0 : index
    %c0_13 = arith.constant 0 : index
    %14 = vector.load %arg7[%c0_12, %c0_13] : memref<1x64xf32, #tpu.memory_space<vmem>>, vector<1x64xf32>
    %15 = vector.broadcast %14 : vector<1x64xf32> to vector<8x64xf32>
    %16 = arith.addf %13, %15 : vector<8x64xf32>
    %17 = arith.truncf %16 : vector<8x64xf32> to vector<8x64xbf16>
    %c0_14 = arith.constant 0 : index
    %c0_15 = arith.constant 0 : index
    %18 = vector.load %arg16[%c0_14, %c0_15] : memref<8x64xbf16, #tpu.memory_space<vmem>>, vector<8x64xbf16>
    tpu.vector_store %arg16[%c0_14, %c0_15], %17 {strides = array<i32>} : memref<8x64xbf16, #tpu.memory_space<vmem>>, vector<8x64xbf16>,
    %19 = vector.extract_strided_slice %11 {offsets = [0, 0], sizes = [8, 8], strides = [1, 1]} : vector<8x32xbf16> to vector<8x8xbf16>
    %cst_16 = arith.constant 0xFF800000 : f32
    %20 = vector.broadcast %cst_16 : f32 to vector<8x1xf32>
    %cst_17 = arith.constant 0.000000e+00 : f32
    %21 = vector.broadcast %cst_17 : f32 to vector<8x1xf32>
    %cst_18 = arith.constant 0.000000e+00 : f32
    %22 = vector.broadcast %cst_18 : f32 to vector<8x8xf32>
    %c0_i32 = arith.constant 0 : i32
    %c8_i32 = arith.constant 8 : i32
    %23 = arith.muli %c0_i32, %c8_i32 : i32
    %24 = tpu.assume_multiple %23, 8 : i32
    %25 = arith.index_cast %24 : i32 to index
    %c0_19 = arith.constant 0 : index
    %26 = vector.load %arg16[%25, %c0_19] : memref<8x64xbf16, #tpu.memory_space<vmem>>, vector<8x8xbf16>
    %27 = arith.index_cast %24 : i32 to index
    %c32 = arith.constant 32 : index
    %28 = vector.load %arg16[%27, %c32] : memref<8x64xbf16, #tpu.memory_space<vmem>>, vector<8x8xbf16>
    %cst_20 = arith.constant dense<0.000000e+00> : vector<8x8xf32>
    %29 = tpu.matmul %19, %26, %cst_20 {dimension_numbers = #tpu.dot_dimension_numbers<[1], [1], [0], [0], [0, 0, 1, 0], [], []>} : vector<8x8xbf16>, vector<8x8xbf16>, vector<8x8xf32> -> vector<8x8xf32>
    %cst_21 = arith.constant dense<0xFF800000> : vector<8xf32>
    %30 = vector.multi_reduction <maximumf>, %29, %cst_21 [1] : vector<8x8xf32> to vector<8xf32>
    %31 = vector.shape_cast %30 : vector<8xf32> to vector<8x1xf32>
    %32 = arith.maximumf %20, %31 : vector<8x1xf32>
    %33 = arith.subf %20, %32 : vector<8x1xf32>
    %34 = math.exp %33 : vector<8x1xf32>
    %35 = vector.broadcast %32 : vector<8x1xf32> to vector<8x8xf32>
    %36 = arith.subf %29, %35 : vector<8x8xf32>
    %37 = math.exp %36 : vector<8x8xf32>
    %38 = arith.truncf %37 : vector<8x8xf32> to vector<8x8xbf16>
    %39 = arith.mulf %34, %21 : vector<8x1xf32>
    %cst_22 = arith.constant dense<0.000000e+00> : vector<8xf32>
    %40 = vector.multi_reduction <add>, %37, %cst_22 [1] : vector<8x8xf32> to vector<8xf32>
    %41 = vector.shape_cast %40 : vector<8xf32> to vector<8x1xf32>
    %42 = arith.addf %39, %41 : vector<8x1xf32>
    %43 = vector.broadcast %34 : vector<8x1xf32> to vector<8x8xf32>
    %44 = arith.mulf %43, %22 : vector<8x8xf32>
    %cst_23 = arith.constant dense<0.000000e+00> : vector<8x8xf32>
    %45 = tpu.matmul %38, %28, %cst_23 {dimension_numbers = #tpu.dot_dimension_numbers<[1], [0], [0], [1], [0, 0, 1, 1], [], []>} : vector<8x8xbf16>, vector<8x8xbf16>, vector<8x8xf32> -> vector<8x8xf32>
    %46 = arith.addf %44, %45 : vector<8x8xf32>
    %c1_i32 = arith.constant 1 : i32
    %47 = tpu.reciprocal %42 {approx = true} : vector<8x1xf32> -> vector<8x1xf32>
    %48 = vector.broadcast %47 : vector<8x1xf32> to vector<8x8xf32>
    %49 = arith.mulf %46, %48 : vector<8x8xf32>
    %50 = arith.truncf %49 : vector<8x8xf32> to vector<8x8xbf16>
    %c0_24 = arith.constant 0 : index
    %c0_25 = arith.constant 0 : index
    %51 = vector.load %arg17[%c0_24, %c0_25] : memref<8x32xbf16, #tpu.memory_space<vmem>>, vector<8x8xbf16>
    tpu.vector_store %arg17[%c0_24, %c0_25], %50 {strides = array<i32>} : memref<8x32xbf16, #tpu.memory_space<vmem>>, vector<8x8xbf16>,
    %52 = vector.extract_strided_slice %11 {offsets = [0, 8], sizes = [8, 8], strides = [1, 1]} : vector<8x32xbf16> to vector<8x8xbf16>
    %cst_26 = arith.constant 0xFF800000 : f32
    %53 = vector.broadcast %cst_26 : f32 to vector<8x1xf32>
    %cst_27 = arith.constant 0.000000e+00 : f32
    %54 = vector.broadcast %cst_27 : f32 to vector<8x1xf32>
    %cst_28 = arith.constant 0.000000e+00 : f32
    %55 = vector.broadcast %cst_28 : f32 to vector<8x8xf32>
    %c0_i32_29 = arith.constant 0 : i32
    %c8_i32_30 = arith.constant 8 : i32
    %56 = arith.muli %c0_i32_29, %c8_i32_30 : i32
    %57 = tpu.assume_multiple %56, 8 : i32
    %58 = arith.index_cast %57 : i32 to index
    %c8 = arith.constant 8 : index
    %59 = vector.load %arg16[%58, %c8] : memref<8x64xbf16, #tpu.memory_space<vmem>>, vector<8x8xbf16>
    %60 = arith.index_cast %57 : i32 to index
    %c40 = arith.constant 40 : index
    %61 = vector.load %arg16[%60, %c40] : memref<8x64xbf16, #tpu.memory_space<vmem>>, vector<8x8xbf16>
    %cst_31 = arith.constant dense<0.000000e+00> : vector<8x8xf32>
    %62 = tpu.matmul %52, %59, %cst_31 {dimension_numbers = #tpu.dot_dimension_numbers<[1], [1], [0], [0], [0, 0, 1, 0], [], []>} : vector<8x8xbf16>, vector<8x8xbf16>, vector<8x8xf32> -> vector<8x8xf32>
    %cst_32 = arith.constant dense<0xFF800000> : vector<8xf32>
    %63 = vector.multi_reduction <maximumf>, %62, %cst_32 [1] : vector<8x8xf32> to vector<8xf32>
    %64 = vector.shape_cast %63 : vector<8xf32> to vector<8x1xf32>
    %65 = arith.maximumf %53, %64 : vector<8x1xf32>
    %66 = arith.subf %53, %65 : vector<8x1xf32>
    %67 = math.exp %66 : vector<8x1xf32>
    %68 = vector.broadcast %65 : vector<8x1xf32> to vector<8x8xf32>
    %69 = arith.subf %62, %68 : vector<8x8xf32>
    %70 = math.exp %69 : vector<8x8xf32>
    %71 = arith.truncf %70 : vector<8x8xf32> to vector<8x8xbf16>
    %72 = arith.mulf %67, %54 : vector<8x1xf32>
    %cst_33 = arith.constant dense<0.000000e+00> : vector<8xf32>
    %73 = vector.multi_reduction <add>, %70, %cst_33 [1] : vector<8x8xf32> to vector<8xf32>
    %74 = vector.shape_cast %73 : vector<8xf32> to vector<8x1xf32>
    %75 = arith.addf %72, %74 : vector<8x1xf32>
    %76 = vector.broadcast %67 : vector<8x1xf32> to vector<8x8xf32>
    %77 = arith.mulf %76, %55 : vector<8x8xf32>
    %cst_34 = arith.constant dense<0.000000e+00> : vector<8x8xf32>
    %78 = tpu.matmul %71, %61, %cst_34 {dimension_numbers = #tpu.dot_dimension_numbers<[1], [0], [0], [1], [0, 0, 1, 1], [], []>} : vector<8x8xbf16>, vector<8x8xbf16>, vector<8x8xf32> -> vector<8x8xf32>
    %79 = arith.addf %77, %78 : vector<8x8xf32>
    %c1_i32_35 = arith.constant 1 : i32
    %80 = tpu.reciprocal %75 {approx = true} : vector<8x1xf32> -> vector<8x1xf32>
    %81 = vector.broadcast %80 : vector<8x1xf32> to vector<8x8xf32>
    %82 = arith.mulf %79, %81 : vector<8x8xf32>
    %83 = arith.truncf %82 : vector<8x8xf32> to vector<8x8xbf16>
    %c0_36 = arith.constant 0 : index
    %c8_37 = arith.constant 8 : index
    %84 = vector.load %arg17[%c0_36, %c8_37] : memref<8x32xbf16, #tpu.memory_space<vmem>>, vector<8x8xbf16>
    tpu.vector_store %arg17[%c0_36, %c8_37], %83 {strides = array<i32>} : memref<8x32xbf16, #tpu.memory_space<vmem>>, vector<8x8xbf16>,
    %85 = vector.extract_strided_slice %11 {offsets = [0, 16], sizes = [8, 8], strides = [1, 1]} : vector<8x32xbf16> to vector<8x8xbf16>
    %cst_38 = arith.constant 0xFF800000 : f32
    %86 = vector.broadcast %cst_38 : f32 to vector<8x1xf32>
    %cst_39 = arith.constant 0.000000e+00 : f32
    %87 = vector.broadcast %cst_39 : f32 to vector<8x1xf32>
    %cst_40 = arith.constant 0.000000e+00 : f32
    %88 = vector.broadcast %cst_40 : f32 to vector<8x8xf32>
    %c0_i32_41 = arith.constant 0 : i32
    %c8_i32_42 = arith.constant 8 : i32
    %89 = arith.muli %c0_i32_41, %c8_i32_42 : i32
    %90 = tpu.assume_multiple %89, 8 : i32
    %91 = arith.index_cast %90 : i32 to index
    %c16 = arith.constant 16 : index
    %92 = vector.load %arg16[%91, %c16] : memref<8x64xbf16, #tpu.memory_space<vmem>>, vector<8x8xbf16>
    %93 = arith.index_cast %90 : i32 to index
    %c48 = arith.constant 48 : index
    %94 = vector.load %arg16[%93, %c48] : memref<8x64xbf16, #tpu.memory_space<vmem>>, vector<8x8xbf16>
    %cst_43 = arith.constant dense<0.000000e+00> : vector<8x8xf32>
    %95 = tpu.matmul %85, %92, %cst_43 {dimension_numbers = #tpu.dot_dimension_numbers<[1], [1], [0], [0], [0, 0, 1, 0], [], []>} : vector<8x8xbf16>, vector<8x8xbf16>, vector<8x8xf32> -> vector<8x8xf32>
    %cst_44 = arith.constant dense<0xFF800000> : vector<8xf32>
    %96 = vector.multi_reduction <maximumf>, %95, %cst_44 [1] : vector<8x8xf32> to vector<8xf32>
    %97 = vector.shape_cast %96 : vector<8xf32> to vector<8x1xf32>
    %98 = arith.maximumf %86, %97 : vector<8x1xf32>
    %99 = arith.subf %86, %98 : vector<8x1xf32>
    %100 = math.exp %99 : vector<8x1xf32>
    %101 = vector.broadcast %98 : vector<8x1xf32> to vector<8x8xf32>
    %102 = arith.subf %95, %101 : vector<8x8xf32>
    %103 = math.exp %102 : vector<8x8xf32>
    %104 = arith.truncf %103 : vector<8x8xf32> to vector<8x8xbf16>
    %105 = arith.mulf %100, %87 : vector<8x1xf32>
    %cst_45 = arith.constant dense<0.000000e+00> : vector<8xf32>
    %106 = vector.multi_reduction <add>, %103, %cst_45 [1] : vector<8x8xf32> to vector<8xf32>
    %107 = vector.shape_cast %106 : vector<8xf32> to vector<8x1xf32>
    %108 = arith.addf %105, %107 : vector<8x1xf32>
    %109 = vector.broadcast %100 : vector<8x1xf32> to vector<8x8xf32>
    %110 = arith.mulf %109, %88 : vector<8x8xf32>
    %cst_46 = arith.constant dense<0.000000e+00> : vector<8x8xf32>
    %111 = tpu.matmul %104, %94, %cst_46 {dimension_numbers = #tpu.dot_dimension_numbers<[1], [0], [0], [1], [0, 0, 1, 1], [], []>} : vector<8x8xbf16>, vector<8x8xbf16>, vector<8x8xf32> -> vector<8x8xf32>
    %112 = arith.addf %110, %111 : vector<8x8xf32>
    %c1_i32_47 = arith.constant 1 : i32
    %113 = tpu.reciprocal %108 {approx = true} : vector<8x1xf32> -> vector<8x1xf32>
    %114 = vector.broadcast %113 : vector<8x1xf32> to vector<8x8xf32>
    %115 = arith.mulf %112, %114 : vector<8x8xf32>
    %116 = arith.truncf %115 : vector<8x8xf32> to vector<8x8xbf16>
    %c0_48 = arith.constant 0 : index
    %c16_49 = arith.constant 16 : index
    %117 = vector.load %arg17[%c0_48, %c16_49] : memref<8x32xbf16, #tpu.memory_space<vmem>>, vector<8x8xbf16>
    tpu.vector_store %arg17[%c0_48, %c16_49], %116 {strides = array<i32>} : memref<8x32xbf16, #tpu.memory_space<vmem>>, vector<8x8xbf16>,
    %118 = vector.extract_strided_slice %11 {offsets = [0, 24], sizes = [8, 8], strides = [1, 1]} : vector<8x32xbf16> to vector<8x8xbf16>
    %cst_50 = arith.constant 0xFF800000 : f32
    %119 = vector.broadcast %cst_50 : f32 to vector<8x1xf32>
    %cst_51 = arith.constant 0.000000e+00 : f32
    %120 = vector.broadcast %cst_51 : f32 to vector<8x1xf32>
    %cst_52 = arith.constant 0.000000e+00 : f32
    %121 = vector.broadcast %cst_52 : f32 to vector<8x8xf32>
    %c0_i32_53 = arith.constant 0 : i32
    %c8_i32_54 = arith.constant 8 : i32
    %122 = arith.muli %c0_i32_53, %c8_i32_54 : i32
    %123 = tpu.assume_multiple %122, 8 : i32
    %124 = arith.index_cast %123 : i32 to index
    %c24 = arith.constant 24 : index
    %125 = vector.load %arg16[%124, %c24] : memref<8x64xbf16, #tpu.memory_space<vmem>>, vector<8x8xbf16>
    %126 = arith.index_cast %123 : i32 to index
    %c56 = arith.constant 56 : index
    %127 = vector.load %arg16[%126, %c56] : memref<8x64xbf16, #tpu.memory_space<vmem>>, vector<8x8xbf16>
    %cst_55 = arith.constant dense<0.000000e+00> : vector<8x8xf32>
    %128 = tpu.matmul %118, %125, %cst_55 {dimension_numbers = #tpu.dot_dimension_numbers<[1], [1], [0], [0], [0, 0, 1, 0], [], []>} : vector<8x8xbf16>, vector<8x8xbf16>, vector<8x8xf32> -> vector<8x8xf32>
    %cst_56 = arith.constant dense<0xFF800000> : vector<8xf32>
    %129 = vector.multi_reduction <maximumf>, %128, %cst_56 [1] : vector<8x8xf32> to vector<8xf32>
    %130 = vector.shape_cast %129 : vector<8xf32> to vector<8x1xf32>
    %131 = arith.maximumf %119, %130 : vector<8x1xf32>
    %132 = arith.subf %119, %131 : vector<8x1xf32>
    %133 = math.exp %132 : vector<8x1xf32>
    %134 = vector.broadcast %131 : vector<8x1xf32> to vector<8x8xf32>
    %135 = arith.subf %128, %134 : vector<8x8xf32>
    %136 = math.exp %135 : vector<8x8xf32>
    %137 = arith.truncf %136 : vector<8x8xf32> to vector<8x8xbf16>
    %138 = arith.mulf %133, %120 : vector<8x1xf32>
    %cst_57 = arith.constant dense<0.000000e+00> : vector<8xf32>
    %139 = vector.multi_reduction <add>, %136, %cst_57 [1] : vector<8x8xf32> to vector<8xf32>
    %140 = vector.shape_cast %139 : vector<8xf32> to vector<8x1xf32>
    %141 = arith.addf %138, %140 : vector<8x1xf32>
    %142 = vector.broadcast %133 : vector<8x1xf32> to vector<8x8xf32>
    %143 = arith.mulf %142, %121 : vector<8x8xf32>
    %cst_58 = arith.constant dense<0.000000e+00> : vector<8x8xf32>
    %144 = tpu.matmul %137, %127, %cst_58 {dimension_numbers = #tpu.dot_dimension_numbers<[1], [0], [0], [1], [0, 0, 1, 1], [], []>} : vector<8x8xbf16>, vector<8x8xbf16>, vector<8x8xf32> -> vector<8x8xf32>
    %145 = arith.addf %143, %144 : vector<8x8xf32>
    %c1_i32_59 = arith.constant 1 : i32
    %146 = tpu.reciprocal %141 {approx = true} : vector<8x1xf32> -> vector<8x1xf32>
    %147 = vector.broadcast %146 : vector<8x1xf32> to vector<8x8xf32>
    %148 = arith.mulf %145, %147 : vector<8x8xf32>
    %149 = arith.truncf %148 : vector<8x8xf32> to vector<8x8xbf16>
    %c0_60 = arith.constant 0 : index
    %c24_61 = arith.constant 24 : index
    %150 = vector.load %arg17[%c0_60, %c24_61] : memref<8x32xbf16, #tpu.memory_space<vmem>>, vector<8x8xbf16>
    tpu.vector_store %arg17[%c0_60, %c24_61], %149 {strides = array<i32>} : memref<8x32xbf16, #tpu.memory_space<vmem>>, vector<8x8xbf16>,
    %c0_62 = arith.constant 0 : index
    %c0_63 = arith.constant 0 : index
    %151 = vector.load %arg17[%c0_62, %c0_63] : memref<8x32xbf16, #tpu.memory_space<vmem>>, vector<8x32xbf16>
    %c0_64 = arith.constant 0 : index
    %c0_65 = arith.constant 0 : index
    %152 = vector.load %arg8[%c0_64, %c0_65] : memref<32x32xbf16, #tpu.memory_space<vmem>>, vector<32x32xbf16>
    %cst_66 = arith.constant dense<0.000000e+00> : vector<8x32xf32>
    %153 = tpu.matmul %151, %152, %cst_66 {dimension_numbers = #tpu.dot_dimension_numbers<[1], [0], [0], [1], [0, 0, 1, 1], [], []>} : vector<8x32xbf16>, vector<32x32xbf16>, vector<8x32xf32> -> vector<8x32xf32>
    %c0_67 = arith.constant 0 : index
    %c0_68 = arith.constant 0 : index
    %154 = vector.load %arg9[%c0_67, %c0_68] : memref<1x32xf32, #tpu.memory_space<vmem>>, vector<1x32xf32>
    %155 = vector.broadcast %154 : vector<1x32xf32> to vector<8x32xf32>
    %156 = arith.addf %153, %155 : vector<8x32xf32>
    %c0_69 = arith.constant 0 : index
    %c0_70 = arith.constant 0 : index
    %157 = vector.load %arg10[%c0_69, %c0_70] : memref<32x64xbf16, #tpu.memory_space<vmem>>, vector<32x64xbf16>
    %cst_71 = arith.constant dense<0.000000e+00> : vector<8x64xf32>
    %158 = tpu.matmul %2, %157, %cst_71 {dimension_numbers = #tpu.dot_dimension_numbers<[1], [0], [0], [1], [0, 0, 1, 1], [], []>} : vector<8x32xbf16>, vector<32x64xbf16>, vector<8x64xf32> -> vector<8x64xf32>
    %159 = arith.truncf %156 : vector<8x32xf32> to vector<8x32xbf16>
    %c0_72 = arith.constant 0 : index
    %c0_73 = arith.constant 0 : index
    %160 = vector.load %arg11[%c0_72, %c0_73] : memref<32x64xbf16, #tpu.memory_space<vmem>>, vector<32x64xbf16>
    %cst_74 = arith.constant dense<0.000000e+00> : vector<8x64xf32>
    %161 = tpu.matmul %159, %160, %cst_74 {dimension_numbers = #tpu.dot_dimension_numbers<[1], [0], [0], [1], [0, 0, 1, 1], [], []>} : vector<8x32xbf16>, vector<32x64xbf16>, vector<8x64xf32> -> vector<8x64xf32>
    %162 = arith.addf %158, %161 : vector<8x64xf32>
    %c0_75 = arith.constant 0 : index
    %c0_76 = arith.constant 0 : index
    %163 = vector.load %arg12[%c0_75, %c0_76] : memref<1x64xf32, #tpu.memory_space<vmem>>, vector<1x64xf32>
    %164 = vector.broadcast %163 : vector<1x64xf32> to vector<8x64xf32>
    %165 = arith.addf %162, %164 : vector<8x64xf32>
    %cst_77 = arith.constant dense<0.000000e+00> : vector<64xf32>
    %166 = vector.multi_reduction <add>, %165, %cst_77 [0] : vector<8x64xf32> to vector<64xf32>
    %167 = vector.shape_cast %166 : vector<64xf32> to vector<1x64xf32>
    %cst_78 = arith.constant 1.250000e-01 : f32
    %168 = vector.broadcast %cst_78 : f32 to vector<1x64xf32>
    %169 = arith.mulf %167, %168 : vector<1x64xf32>
    %170 = vector.broadcast %169 : vector<1x64xf32> to vector<8x64xf32>
    %171 = arith.subf %165, %170 : vector<8x64xf32>
    %172 = arith.mulf %171, %171 : vector<8x64xf32>
    %cst_79 = arith.constant dense<0.000000e+00> : vector<64xf32>
    %173 = vector.multi_reduction <add>, %172, %cst_79 [0] : vector<8x64xf32> to vector<64xf32>
    %174 = vector.shape_cast %173 : vector<64xf32> to vector<1x64xf32>
    %cst_80 = arith.constant 1.250000e-01 : f32
    %175 = vector.broadcast %cst_80 : f32 to vector<1x64xf32>
    %176 = arith.mulf %174, %175 : vector<1x64xf32>
    %cst_81 = arith.constant 9.99999974E-6 : f32
    %177 = vector.broadcast %cst_81 : f32 to vector<1x64xf32>
    %178 = arith.addf %176, %177 : vector<1x64xf32>
    %179 = math.rsqrt %178 : vector<1x64xf32>
    %180 = vector.broadcast %179 : vector<1x64xf32> to vector<8x64xf32>
    %181 = arith.mulf %171, %180 : vector<8x64xf32>
    %cst_82 = arith.constant 0.000000e+00 : f32
    %182 = vector.broadcast %cst_82 : f32 to vector<8x64xf32>
    %183 = arith.maximumf %181, %182 : vector<8x64xf32>
    %184 = arith.truncf %183 : vector<8x64xf32> to vector<8x64xbf16>
    %c0_83 = arith.constant 0 : index
    %c0_84 = arith.constant 0 : index
    %185 = vector.load %arg13[%c0_83, %c0_84] : memref<64x32xbf16, #tpu.memory_space<vmem>>, vector<64x32xbf16>
    %cst_85 = arith.constant dense<0.000000e+00> : vector<8x32xf32>
    %186 = tpu.matmul %184, %185, %cst_85 {dimension_numbers = #tpu.dot_dimension_numbers<[1], [0], [0], [1], [0, 0, 1, 1], [], []>} : vector<8x64xbf16>, vector<64x32xbf16>, vector<8x32xf32> -> vector<8x32xf32>
    %c0_86 = arith.constant 0 : index
    %c0_87 = arith.constant 0 : index
    %187 = vector.load %arg14[%c0_86, %c0_87] : memref<1x32xf32, #tpu.memory_space<vmem>>, vector<1x32xf32>
    %188 = vector.broadcast %187 : vector<1x32xf32> to vector<8x32xf32>
    %189 = arith.addf %186, %188 : vector<8x32xf32>
    %190 = arith.addf %1, %189 : vector<8x32xf32>
    %c0_88 = arith.constant 0 : index
    %c0_89 = arith.constant 0 : index
    %c0_90 = arith.constant 0 : index
    %191 = vector.load %arg15[%c0_88, %c0_89, %c0_90] : memref<1x8x32xf32, #tpu.memory_space<vmem>>, vector<1x8x32xf32>
    %192 = vector.shape_cast %191 : vector<1x8x32xf32> to vector<8x32xf32>
    %193 = vector.shape_cast %190 : vector<8x32xf32> to vector<1x8x32xf32>
    tpu.vector_store %arg15[%c0_88, %c0_89, %c0_90], %193 {strides = array<i32>} : memref<1x8x32xf32, #tpu.memory_space<vmem>>, vector<1x8x32xf32>,
    return
  }
  func.func @transform_0(%arg0: i32, %arg1: memref<4xi32, #tpu.memory_space<smem>>) -> (i32, i32, i32) {
    %c0_i32 = arith.constant 0 : i32
    %c0_i32_0 = arith.constant 0 : i32
    %c0_i32_1 = arith.constant 0 : i32
    return %arg0, %c0_i32, %c0_i32_0 : i32, i32, i32
  }
  func.func @transform_1(%arg0: i32, %arg1: memref<4xi32, #tpu.memory_space<smem>>) -> (i32, i32, i32) {
    %0 = arith.index_cast %arg0 : i32 to index
    %1 = memref.load %arg1[%0] : memref<4xi32, #tpu.memory_space<smem>>
    %c0_i32 = arith.constant 0 : i32
    %c0_i32_0 = arith.constant 0 : i32
    %c0_i32_1 = arith.constant 0 : i32
    return %1, %c0_i32, %c0_i32_0 : i32, i32, i32
  }
  func.func @transform_2(%arg0: i32, %arg1: memref<4xi32, #tpu.memory_space<smem>>) -> (i32, i32) {
    %c0_i32 = arith.constant 0 : i32
    %c0_i32_0 = arith.constant 0 : i32
    %c0_i32_1 = arith.constant 0 : i32
    return %c0_i32, %c0_i32_0 : i32, i32
  }
  func.func @transform_3(%arg0: i32, %arg1: memref<4xi32, #tpu.memory_space<smem>>) -> (i32, i32) {
    %c0_i32 = arith.constant 0 : i32
    %c0_i32_0 = arith.constant 0 : i32
    %c0_i32_1 = arith.constant 0 : i32
    return %c0_i32, %c0_i32_0 : i32, i32
  }
  func.func @transform_4(%arg0: i32, %arg1: memref<4xi32, #tpu.memory_space<smem>>) -> (i32, i32) {
    %c0_i32 = arith.constant 0 : i32
    %c0_i32_0 = arith.constant 0 : i32
    %c0_i32_1 = arith.constant 0 : i32
    return %c0_i32, %c0_i32_0 : i32, i32
  }
  func.func @transform_5(%arg0: i32, %arg1: memref<4xi32, #tpu.memory_space<smem>>) -> (i32, i32) {
    %c0_i32 = arith.constant 0 : i32
    %c0_i32_0 = arith.constant 0 : i32
    %c0_i32_1 = arith.constant 0 : i32
    return %c0_i32, %c0_i32_0 : i32, i32
  }
  func.func @transform_6(%arg0: i32, %arg1: memref<4xi32, #tpu.memory_space<smem>>) -> (i32, i32) {
    %c0_i32 = arith.constant 0 : i32
    %c0_i32_0 = arith.constant 0 : i32
    %c0_i32_1 = arith.constant 0 : i32
    return %c0_i32, %c0_i32_0 : i32, i32
  }
  func.func @transform_7(%arg0: i32, %arg1: memref<4xi32, #tpu.memory_space<smem>>) -> (i32, i32) {
    %c0_i32 = arith.constant 0 : i32
    %c0_i32_0 = arith.constant 0 : i32
    %c0_i32_1 = arith.constant 0 : i32
    return %c0_i32, %c0_i32_0 : i32, i32
  }
  func.func @transform_8(%arg0: i32, %arg1: memref<4xi32, #tpu.memory_space<smem>>) -> (i32, i32) {
    %c0_i32 = arith.constant 0 : i32
    %c0_i32_0 = arith.constant 0 : i32
    %c0_i32_1 = arith.constant 0 : i32
    return %c0_i32, %c0_i32_0 : i32, i32
  }
  func.func @transform_9(%arg0: i32, %arg1: memref<4xi32, #tpu.memory_space<smem>>) -> (i32, i32) {
    %c0_i32 = arith.constant 0 : i32
    %c0_i32_0 = arith.constant 0 : i32
    %c0_i32_1 = arith.constant 0 : i32
    return %c0_i32, %c0_i32_0 : i32, i32
  }
  func.func @transform_10(%arg0: i32, %arg1: memref<4xi32, #tpu.memory_space<smem>>) -> (i32, i32) {
    %c0_i32 = arith.constant 0 : i32
    %c0_i32_0 = arith.constant 0 : i32
    %c0_i32_1 = arith.constant 0 : i32
    return %c0_i32, %c0_i32_0 : i32, i32
  }
  func.func @transform_11(%arg0: i32, %arg1: memref<4xi32, #tpu.memory_space<smem>>) -> (i32, i32) {
    %c0_i32 = arith.constant 0 : i32
    %c0_i32_0 = arith.constant 0 : i32
    %c0_i32_1 = arith.constant 0 : i32
    return %c0_i32, %c0_i32_0 : i32, i32
  }
  func.func @transform_12(%arg0: i32, %arg1: memref<4xi32, #tpu.memory_space<smem>>) -> (i32, i32) {
    %c0_i32 = arith.constant 0 : i32
    %c0_i32_0 = arith.constant 0 : i32
    %c0_i32_1 = arith.constant 0 : i32
    return %c0_i32, %c0_i32_0 : i32, i32
  }
  func.func @transform_13(%arg0: i32, %arg1: memref<4xi32, #tpu.memory_space<smem>>) -> (i32, i32, i32) {
    %c0_i32 = arith.constant 0 : i32
    %c0_i32_0 = arith.constant 0 : i32
    %c0_i32_1 = arith.constant 0 : i32
    return %arg0, %c0_i32, %c0_i32_0 : i32, i32, i32
  }
}

module attributes {stable_mosaic.version = 11 : i64} {
  func.func @attn_prop_kernel(%arg0: i32, %arg1: memref<4xi32, #tpu.memory_space<smem>>, %arg2: memref<1x8x32xf32, #tpu.memory_space<vmem>>, %arg3: memref<1x8x32xf32, #tpu.memory_space<vmem>>, %arg4: memref<32x32xbf16, #tpu.memory_space<vmem>>, %arg5: memref<1x32xf32, #tpu.memory_space<vmem>>, %arg6: memref<32x64xbf16, #tpu.memory_space<vmem>>, %arg7: memref<1x64xf32, #tpu.memory_space<vmem>>, %arg8: memref<32x32xbf16, #tpu.memory_space<vmem>>, %arg9: memref<1x32xf32, #tpu.memory_space<vmem>>, %arg10: memref<32x64xbf16, #tpu.memory_space<vmem>>, %arg11: memref<32x64xbf16, #tpu.memory_space<vmem>>, %arg12: memref<1x64xf32, #tpu.memory_space<vmem>>, %arg13: memref<64x32xbf16, #tpu.memory_space<vmem>>, %arg14: memref<1x32xf32, #tpu.memory_space<vmem>>, %arg15: memref<1x8x32xf32, #tpu.memory_space<vmem>>, %arg16: memref<8x64xbf16, #tpu.memory_space<vmem>>, %arg17: memref<8x32xbf16, #tpu.memory_space<vmem>>) attributes {dimension_semantics = [#tpu.dimension_semantics<parallel>], iteration_bounds = array<i64: 4>, scalar_prefetch = 1 : i64, scratch_operands = 2 : i64, tpu.core_type = #tpu.core_type<tc>, window_params = [{transform_indices = @transform_0, window_bounds = array<i64: 1, 8, 32>}, {transform_indices = @transform_1, window_bounds = array<i64: 1, 8, 32>}, {pipeline_mode = #tpu.pipeline_mode<synchronous>, transform_indices = @transform_2, window_bounds = array<i64: 32, 32>}, {pipeline_mode = #tpu.pipeline_mode<synchronous>, transform_indices = @transform_3, window_bounds = array<i64: 1, 32>}, {pipeline_mode = #tpu.pipeline_mode<synchronous>, transform_indices = @transform_4, window_bounds = array<i64: 32, 64>}, {pipeline_mode = #tpu.pipeline_mode<synchronous>, transform_indices = @transform_5, window_bounds = array<i64: 1, 64>}, {pipeline_mode = #tpu.pipeline_mode<synchronous>, transform_indices = @transform_6, window_bounds = array<i64: 32, 32>}, {pipeline_mode = #tpu.pipeline_mode<synchronous>, transform_indices = @transform_7, window_bounds = array<i64: 1, 32>}, {pipeline_mode = #tpu.pipeline_mode<synchronous>, transform_indices = @transform_8, window_bounds = array<i64: 32, 64>}, {pipeline_mode = #tpu.pipeline_mode<synchronous>, transform_indices = @transform_9, window_bounds = array<i64: 32, 64>}, {pipeline_mode = #tpu.pipeline_mode<synchronous>, transform_indices = @transform_10, window_bounds = array<i64: 1, 64>}, {pipeline_mode = #tpu.pipeline_mode<synchronous>, transform_indices = @transform_11, window_bounds = array<i64: 64, 32>}, {pipeline_mode = #tpu.pipeline_mode<synchronous>, transform_indices = @transform_12, window_bounds = array<i64: 1, 32>}, {transform_indices = @transform_13, window_bounds = array<i64: 1, 8, 32>}]} {
    %c0 = arith.constant 0 : index
    %c0_0 = arith.constant 0 : index
    %c0_1 = arith.constant 0 : index
    %0 = vector.load %arg2[%c0, %c0_0, %c0_1] : memref<1x8x32xf32, #tpu.memory_space<vmem>>, vector<1x8x32xf32>
    %1 = vector.shape_cast %0 : vector<1x8x32xf32> to vector<8x32xf32>
    %2 = arith.truncf %1 : vector<8x32xf32> to vector<8x32xbf16>
    %c0_2 = arith.constant 0 : index
    %c0_3 = arith.constant 0 : index
    %c0_4 = arith.constant 0 : index
    %3 = vector.load %arg3[%c0_2, %c0_3, %c0_4] : memref<1x8x32xf32, #tpu.memory_space<vmem>>, vector<1x8x32xf32>
    %4 = vector.shape_cast %3 : vector<1x8x32xf32> to vector<8x32xf32>
    %5 = arith.truncf %4 : vector<8x32xf32> to vector<8x32xbf16>
    %c0_5 = arith.constant 0 : index
    %c0_6 = arith.constant 0 : index
    %6 = vector.load %arg4[%c0_5, %c0_6] : memref<32x32xbf16, #tpu.memory_space<vmem>>, vector<32x32xbf16>
    %cst = arith.constant dense<0.000000e+00> : vector<8x32xf32>
    %7 = tpu.matmul %2, %6, %cst {dimension_numbers = #tpu.dot_dimension_numbers<[1], [0], [0], [1], [0, 0, 1, 1], [], []>} : vector<8x32xbf16>, vector<32x32xbf16>, vector<8x32xf32> -> vector<8x32xf32>
    %c0_7 = arith.constant 0 : index
    %c0_8 = arith.constant 0 : index
    %8 = vector.load %arg5[%c0_7, %c0_8] : memref<1x32xf32, #tpu.memory_space<vmem>>, vector<1x32xf32>
    %9 = vector.broadcast %8 : vector<1x32xf32> to vector<8x32xf32>
    %10 = arith.addf %7, %9 : vector<8x32xf32>
    %11 = arith.truncf %10 : vector<8x32xf32> to vector<8x32xbf16>
    %c0_9 = arith.constant 0 : index
    %c0_10 = arith.constant 0 : index
    %12 = vector.load %arg6[%c0_9, %c0_10] : memref<32x64xbf16, #tpu.memory_space<vmem>>, vector<32x64xbf16>
    %cst_11 = arith.constant dense<0.000000e+00> : vector<8x64xf32>
    %13 = tpu.matmul %5, %12, %cst_11 {dimension_numbers = #tpu.dot_dimension_numbers<[1], [0], [0], [1], [0, 0, 1, 1], [], []>} : vector<8x32xbf16>, vector<32x64xbf16>, vector<8x64xf32> -> vector<8x64xf32>
    %c0_12 = arith.constant 0 : index
    %c0_13 = arith.constant 0 : index
    %14 = vector.load %arg7[%c0_12, %c0_13] : memref<1x64xf32, #tpu.memory_space<vmem>>, vector<1x64xf32>
    %15 = vector.broadcast %14 : vector<1x64xf32> to vector<8x64xf32>
    %16 = arith.addf %13, %15 : vector<8x64xf32>
    %17 = arith.truncf %16 : vector<8x64xf32> to vector<8x64xbf16>
    %c0_14 = arith.constant 0 : index
    %c0_15 = arith.constant 0 : index
    %18 = vector.load %arg16[%c0_14, %c0_15] : memref<8x64xbf16, #tpu.memory_space<vmem>>, vector<8x64xbf16>
    tpu.vector_store %arg16[%c0_14, %c0_15], %17 {strides = array<i32>} : memref<8x64xbf16, #tpu.memory_space<vmem>>, vector<8x64xbf16>,
    %19 = vector.extract_strided_slice %11 {offsets = [0, 0], sizes = [8, 8], strides = [1, 1]} : vector<8x32xbf16> to vector<8x8xbf16>
    %cst_16 = arith.constant 0xFF800000 : f32
    %20 = vector.broadcast %cst_16 : f32 to vector<8x1xf32>
    %cst_17 = arith.constant 0.000000e+00 : f32
    %21 = vector.broadcast %cst_17 : f32 to vector<8x1xf32>
    %cst_18 = arith.constant 0.000000e+00 : f32
    %22 = vector.broadcast %cst_18 : f32 to vector<8x8xf32>
    %c0_i32 = arith.constant 0 : i32
    %c8_i32 = arith.constant 8 : i32
    %23 = arith.muli %c0_i32, %c8_i32 : i32
    %24 = tpu.assume_multiple %23, 8 : i32
    %25 = arith.index_cast %24 : i32 to index
    %c0_19 = arith.constant 0 : index
    %26 = vector.load %arg16[%25, %c0_19] : memref<8x64xbf16, #tpu.memory_space<vmem>>, vector<8x8xbf16>
    %27 = arith.index_cast %24 : i32 to index
    %c32 = arith.constant 32 : index
    %28 = vector.load %arg16[%27, %c32] : memref<8x64xbf16, #tpu.memory_space<vmem>>, vector<8x8xbf16>
    %cst_20 = arith.constant dense<0.000000e+00> : vector<8x8xf32>
    %29 = tpu.matmul %19, %26, %cst_20 {dimension_numbers = #tpu.dot_dimension_numbers<[1], [1], [0], [0], [0, 0, 1, 0], [], []>} : vector<8x8xbf16>, vector<8x8xbf16>, vector<8x8xf32> -> vector<8x8xf32>
    %cst_21 = arith.constant dense<0xFF800000> : vector<8xf32>
    %30 = vector.multi_reduction <maximumf>, %29, %cst_21 [1] : vector<8x8xf32> to vector<8xf32>
    %31 = vector.shape_cast %30 : vector<8xf32> to vector<8x1xf32>
    %32 = arith.maximumf %20, %31 : vector<8x1xf32>
    %33 = arith.subf %20, %32 : vector<8x1xf32>
    %34 = math.exp %33 : vector<8x1xf32>
    %35 = vector.broadcast %32 : vector<8x1xf32> to vector<8x8xf32>
    %36 = arith.subf %29, %35 : vector<8x8xf32>
    %37 = math.exp %36 : vector<8x8xf32>
    %38 = arith.truncf %37 : vector<8x8xf32> to vector<8x8xbf16>
    %39 = arith.mulf %34, %21 : vector<8x1xf32>
    %cst_22 = arith.constant dense<0.000000e+00> : vector<8xf32>
    %40 = vector.multi_reduction <add>, %37, %cst_22 [1] : vector<8x8xf32> to vector<8xf32>
    %41 = vector.shape_cast %40 : vector<8xf32> to vector<8x1xf32>
    %42 = arith.addf %39, %41 : vector<8x1xf32>
    %43 = vector.broadcast %34 : vector<8x1xf32> to vector<8x8xf32>
    %44 = arith.mulf %43, %22 : vector<8x8xf32>
    %cst_23 = arith.constant dense<0.000000e+00> : vector<8x8xf32>
    %45 = tpu.matmul %38, %28, %cst_23 {dimension_numbers = #tpu.dot_dimension_numbers<[1], [0], [0], [1], [0, 0, 1, 1], [], []>} : vector<8x8xbf16>, vector<8x8xbf16>, vector<8x8xf32> -> vector<8x8xf32>
    %46 = arith.addf %44, %45 : vector<8x8xf32>
    %c1_i32 = arith.constant 1 : i32
    %47 = tpu.reciprocal %42 {approx = true} : vector<8x1xf32> -> vector<8x1xf32>
    %48 = vector.broadcast %47 : vector<8x1xf32> to vector<8x8xf32>
    %49 = arith.mulf %46, %48 : vector<8x8xf32>
    %50 = arith.truncf %49 : vector<8x8xf32> to vector<8x8xbf16>
    %c0_24 = arith.constant 0 : index
    %c0_25 = arith.constant 0 : index
    %51 = vector.load %arg17[%c0_24, %c0_25] : memref<8x32xbf16, #tpu.memory_space<vmem>>, vector<8x8xbf16>
    tpu.vector_store %arg17[%c0_24, %c0_25], %50 {strides = array<i32>} : memref<8x32xbf16, #tpu.memory_space<vmem>>, vector<8x8xbf16>,
    %52 = vector.extract_strided_slice %11 {offsets = [0, 8], sizes = [8, 8], strides = [1, 1]} : vector<8x32xbf16> to vector<8x8xbf16>
    %cst_26 = arith.constant 0xFF800000 : f32
    %53 = vector.broadcast %cst_26 : f32 to vector<8x1xf32>
    %cst_27 = arith.constant 0.000000e+00 : f32
    %54 = vector.broadcast %cst_27 : f32 to vector<8x1xf32>
    %cst_28 = arith.constant 0.000000e+00 : f32
    %55 = vector.broadcast %cst_28 : f32 to vector<8x8xf32>
    %c0_i32_29 = arith.constant 0 : i32
    %c8_i32_30 = arith.constant 8 : i32
    %56 = arith.muli %c0_i32_29, %c8_i32_30 : i32
    %57 = tpu.assume_multiple %56, 8 : i32
    %58 = arith.index_cast %57 : i32 to index
    %c8 = arith.constant 8 : index
    %59 = vector.load %arg16[%58, %c8] : memref<8x64xbf16, #tpu.memory_space<vmem>>, vector<8x8xbf16>
    %60 = arith.index_cast %57 : i32 to index
    %c40 = arith.constant 40 : index
    %61 = vector.load %arg16[%60, %c40] : memref<8x64xbf16, #tpu.memory_space<vmem>>, vector<8x8xbf16>
    %cst_31 = arith.constant dense<0.000000e+00> : vector<8x8xf32>
    %62 = tpu.matmul %52, %59, %cst_31 {dimension_numbers = #tpu.dot_dimension_numbers<[1], [1], [0], [0], [0, 0, 1, 0], [], []>} : vector<8x8xbf16>, vector<8x8xbf16>, vector<8x8xf32> -> vector<8x8xf32>
    %cst_32 = arith.constant dense<0xFF800000> : vector<8xf32>
    %63 = vector.multi_reduction <maximumf>, %62, %cst_32 [1] : vector<8x8xf32> to vector<8xf32>
    %64 = vector.shape_cast %63 : vector<8xf32> to vector<8x1xf32>
    %65 = arith.maximumf %53, %64 : vector<8x1xf32>
    %66 = arith.subf %53, %65 : vector<8x1xf32>
    %67 = math.exp %66 : vector<8x1xf32>
    %68 = vector.broadcast %65 : vector<8x1xf32> to vector<8x8xf32>
    %69 = arith.subf %62, %68 : vector<8x8xf32>
    %70 = math.exp %69 : vector<8x8xf32>
    %71 = arith.truncf %70 : vector<8x8xf32> to vector<8x8xbf16>
    %72 = arith.mulf %67, %54 : vector<8x1xf32>
    %cst_33 = arith.constant dense<0.000000e+00> : vector<8xf32>
    %73 = vector.multi_reduction <add>, %70, %cst_33 [1] : vector<8x8xf32> to vector<8xf32>
    %74 = vector.shape_cast %73 : vector<8xf32> to vector<8x1xf32>
    %75 = arith.addf %72, %74 : vector<8x1xf32>
    %76 = vector.broadcast %67 : vector<8x1xf32> to vector<8x8xf32>
    %77 = arith.mulf %76, %55 : vector<8x8xf32>
    %cst_34 = arith.constant dense<0.000000e+00> : vector<8x8xf32>
    %78 = tpu.matmul %71, %61, %cst_34 {dimension_numbers = #tpu.dot_dimension_numbers<[1], [0], [0], [1], [0, 0, 1, 1], [], []>} : vector<8x8xbf16>, vector<8x8xbf16>, vector<8x8xf32> -> vector<8x8xf32>
    %79 = arith.addf %77, %78 : vector<8x8xf32>
    %c1_i32_35 = arith.constant 1 : i32
    %80 = tpu.reciprocal %75 {approx = true} : vector<8x1xf32> -> vector<8x1xf32>
    %81 = vector.broadcast %80 : vector<8x1xf32> to vector<8x8xf32>
    %82 = arith.mulf %79, %81 : vector<8x8xf32>
    %83 = arith.truncf %82 : vector<8x8xf32> to vector<8x8xbf16>
    %c0_36 = arith.constant 0 : index
    %c8_37 = arith.constant 8 : index
    %84 = vector.load %arg17[%c0_36, %c8_37] : memref<8x32xbf16, #tpu.memory_space<vmem>>, vector<8x8xbf16>
    tpu.vector_store %arg17[%c0_36, %c8_37], %83 {strides = array<i32>} : memref<8x32xbf16, #tpu.memory_space<vmem>>, vector<8x8xbf16>,
    %85 = vector.extract_strided_slice %11 {offsets = [0, 16], sizes = [8, 8], strides = [1, 1]} : vector<8x32xbf16> to vector<8x8xbf16>
    %cst_38 = arith.constant 0xFF800000 : f32
    %86 = vector.broadcast %cst_38 : f32 to vector<8x1xf32>
    %cst_39 = arith.constant 0.000000e+00 : f32
    %87 = vector.broadcast %cst_39 : f32 to vector<8x1xf32>
    %cst_40 = arith.constant 0.000000e+00 : f32
    %88 = vector.broadcast %cst_40 : f32 to vector<8x8xf32>
    %c0_i32_41 = arith.constant 0 : i32
    %c8_i32_42 = arith.constant 8 : i32
    %89 = arith.muli %c0_i32_41, %c8_i32_42 : i32
    %90 = tpu.assume_multiple %89, 8 : i32
    %91 = arith.index_cast %90 : i32 to index
    %c16 = arith.constant 16 : index
    %92 = vector.load %arg16[%91, %c16] : memref<8x64xbf16, #tpu.memory_space<vmem>>, vector<8x8xbf16>
    %93 = arith.index_cast %90 : i32 to index
    %c48 = arith.constant 48 : index
    %94 = vector.load %arg16[%93, %c48] : memref<8x64xbf16, #tpu.memory_space<vmem>>, vector<8x8xbf16>
    %cst_43 = arith.constant dense<0.000000e+00> : vector<8x8xf32>
    %95 = tpu.matmul %85, %92, %cst_43 {dimension_numbers = #tpu.dot_dimension_numbers<[1], [1], [0], [0], [0, 0, 1, 0], [], []>} : vector<8x8xbf16>, vector<8x8xbf16>, vector<8x8xf32> -> vector<8x8xf32>
    %cst_44 = arith.constant dense<0xFF800000> : vector<8xf32>
    %96 = vector.multi_reduction <maximumf>, %95, %cst_44 [1] : vector<8x8xf32> to vector<8xf32>
    %97 = vector.shape_cast %96 : vector<8xf32> to vector<8x1xf32>
    %98 = arith.maximumf %86, %97 : vector<8x1xf32>
    %99 = arith.subf %86, %98 : vector<8x1xf32>
    %100 = math.exp %99 : vector<8x1xf32>
    %101 = vector.broadcast %98 : vector<8x1xf32> to vector<8x8xf32>
    %102 = arith.subf %95, %101 : vector<8x8xf32>
    %103 = math.exp %102 : vector<8x8xf32>
    %104 = arith.truncf %103 : vector<8x8xf32> to vector<8x8xbf16>
    %105 = arith.mulf %100, %87 : vector<8x1xf32>
    %cst_45 = arith.constant dense<0.000000e+00> : vector<8xf32>
    %106 = vector.multi_reduction <add>, %103, %cst_45 [1] : vector<8x8xf32> to vector<8xf32>
    %107 = vector.shape_cast %106 : vector<8xf32> to vector<8x1xf32>
    %108 = arith.addf %105, %107 : vector<8x1xf32>
    %109 = vector.broadcast %100 : vector<8x1xf32> to vector<8x8xf32>
    %110 = arith.mulf %109, %88 : vector<8x8xf32>
    %cst_46 = arith.constant dense<0.000000e+00> : vector<8x8xf32>
    %111 = tpu.matmul %104, %94, %cst_46 {dimension_numbers = #tpu.dot_dimension_numbers<[1], [0], [0], [1], [0, 0, 1, 1], [], []>} : vector<8x8xbf16>, vector<8x8xbf16>, vector<8x8xf32> -> vector<8x8xf32>
    %112 = arith.addf %110, %111 : vector<8x8xf32>
    %c1_i32_47 = arith.constant 1 : i32
    %113 = tpu.reciprocal %108 {approx = true} : vector<8x1xf32> -> vector<8x1xf32>
    %114 = vector.broadcast %113 : vector<8x1xf32> to vector<8x8xf32>
    %115 = arith.mulf %112, %114 : vector<8x8xf32>
    %116 = arith.truncf %115 : vector<8x8xf32> to vector<8x8xbf16>
    %c0_48 = arith.constant 0 : index
    %c16_49 = arith.constant 16 : index
    %117 = vector.load %arg17[%c0_48, %c16_49] : memref<8x32xbf16, #tpu.memory_space<vmem>>, vector<8x8xbf16>
    tpu.vector_store %arg17[%c0_48, %c16_49], %116 {strides = array<i32>} : memref<8x32xbf16, #tpu.memory_space<vmem>>, vector<8x8xbf16>,
    %118 = vector.extract_strided_slice %11 {offsets = [0, 24], sizes = [8, 8], strides = [1, 1]} : vector<8x32xbf16> to vector<8x8xbf16>
    %cst_50 = arith.constant 0xFF800000 : f32
    %119 = vector.broadcast %cst_50 : f32 to vector<8x1xf32>
    %cst_51 = arith.constant 0.000000e+00 : f32
    %120 = vector.broadcast %cst_51 : f32 to vector<8x1xf32>
    %cst_52 = arith.constant 0.000000e+00 : f32
    %121 = vector.broadcast %cst_52 : f32 to vector<8x8xf32>
    %c0_i32_53 = arith.constant 0 : i32
    %c8_i32_54 = arith.constant 8 : i32
    %122 = arith.muli %c0_i32_53, %c8_i32_54 : i32
    %123 = tpu.assume_multiple %122, 8 : i32
    %124 = arith.index_cast %123 : i32 to index
    %c24 = arith.constant 24 : index
    %125 = vector.load %arg16[%124, %c24] : memref<8x64xbf16, #tpu.memory_space<vmem>>, vector<8x8xbf16>
    %126 = arith.index_cast %123 : i32 to index
    %c56 = arith.constant 56 : index
    %127 = vector.load %arg16[%126, %c56] : memref<8x64xbf16, #tpu.memory_space<vmem>>, vector<8x8xbf16>
    %cst_55 = arith.constant dense<0.000000e+00> : vector<8x8xf32>
    %128 = tpu.matmul %118, %125, %cst_55 {dimension_numbers = #tpu.dot_dimension_numbers<[1], [1], [0], [0], [0, 0, 1, 0], [], []>} : vector<8x8xbf16>, vector<8x8xbf16>, vector<8x8xf32> -> vector<8x8xf32>
    %cst_56 = arith.constant dense<0xFF800000> : vector<8xf32>
    %129 = vector.multi_reduction <maximumf>, %128, %cst_56 [1] : vector<8x8xf32> to vector<8xf32>
    %130 = vector.shape_cast %129 : vector<8xf32> to vector<8x1xf32>
    %131 = arith.maximumf %119, %130 : vector<8x1xf32>
    %132 = arith.subf %119, %131 : vector<8x1xf32>
    %133 = math.exp %132 : vector<8x1xf32>
    %134 = vector.broadcast %131 : vector<8x1xf32> to vector<8x8xf32>
    %135 = arith.subf %128, %134 : vector<8x8xf32>
    %136 = math.exp %135 : vector<8x8xf32>
    %137 = arith.truncf %136 : vector<8x8xf32> to vector<8x8xbf16>
    %138 = arith.mulf %133, %120 : vector<8x1xf32>
    %cst_57 = arith.constant dense<0.000000e+00> : vector<8xf32>
    %139 = vector.multi_reduction <add>, %136, %cst_57 [1] : vector<8x8xf32> to vector<8xf32>
    %140 = vector.shape_cast %139 : vector<8xf32> to vector<8x1xf32>
    %141 = arith.addf %138, %140 : vector<8x1xf32>
    %142 = vector.broadcast %133 : vector<8x1xf32> to vector<8x8xf32>
    %143 = arith.mulf %142, %121 : vector<8x8xf32>
    %cst_58 = arith.constant dense<0.000000e+00> : vector<8x8xf32>
    %144 = tpu.matmul %137, %127, %cst_58 {dimension_numbers = #tpu.dot_dimension_numbers<[1], [0], [0], [1], [0, 0, 1, 1], [], []>} : vector<8x8xbf16>, vector<8x8xbf16>, vector<8x8xf32> -> vector<8x8xf32>
    %145 = arith.addf %143, %144 : vector<8x8xf32>
    %c1_i32_59 = arith.constant 1 : i32
    %146 = tpu.reciprocal %141 {approx = true} : vector<8x1xf32> -> vector<8x1xf32>
    %147 = vector.broadcast %146 : vector<8x1xf32> to vector<8x8xf32>
    %148 = arith.mulf %145, %147 : vector<8x8xf32>
    %149 = arith.truncf %148 : vector<8x8xf32> to vector<8x8xbf16>
    %c0_60 = arith.constant 0 : index
    %c24_61 = arith.constant 24 : index
    %150 = vector.load %arg17[%c0_60, %c24_61] : memref<8x32xbf16, #tpu.memory_space<vmem>>, vector<8x8xbf16>
    tpu.vector_store %arg17[%c0_60, %c24_61], %149 {strides = array<i32>} : memref<8x32xbf16, #tpu.memory_space<vmem>>, vector<8x8xbf16>,
    %c0_62 = arith.constant 0 : index
    %c0_63 = arith.constant 0 : index
    %151 = vector.load %arg17[%c0_62, %c0_63] : memref<8x32xbf16, #tpu.memory_space<vmem>>, vector<8x32xbf16>
    %c0_64 = arith.constant 0 : index
    %c0_65 = arith.constant 0 : index
    %152 = vector.load %arg8[%c0_64, %c0_65] : memref<32x32xbf16, #tpu.memory_space<vmem>>, vector<32x32xbf16>
    %cst_66 = arith.constant dense<0.000000e+00> : vector<8x32xf32>
    %153 = tpu.matmul %151, %152, %cst_66 {dimension_numbers = #tpu.dot_dimension_numbers<[1], [0], [0], [1], [0, 0, 1, 1], [], []>} : vector<8x32xbf16>, vector<32x32xbf16>, vector<8x32xf32> -> vector<8x32xf32>
    %c0_67 = arith.constant 0 : index
    %c0_68 = arith.constant 0 : index
    %154 = vector.load %arg9[%c0_67, %c0_68] : memref<1x32xf32, #tpu.memory_space<vmem>>, vector<1x32xf32>
    %155 = vector.broadcast %154 : vector<1x32xf32> to vector<8x32xf32>
    %156 = arith.addf %153, %155 : vector<8x32xf32>
    %c0_69 = arith.constant 0 : index
    %c0_70 = arith.constant 0 : index
    %157 = vector.load %arg10[%c0_69, %c0_70] : memref<32x64xbf16, #tpu.memory_space<vmem>>, vector<32x64xbf16>
    %cst_71 = arith.constant dense<0.000000e+00> : vector<8x64xf32>
    %158 = tpu.matmul %2, %157, %cst_71 {dimension_numbers = #tpu.dot_dimension_numbers<[1], [0], [0], [1], [0, 0, 1, 1], [], []>} : vector<8x32xbf16>, vector<32x64xbf16>, vector<8x64xf32> -> vector<8x64xf32>
    %159 = arith.truncf %156 : vector<8x32xf32> to vector<8x32xbf16>
    %c0_72 = arith.constant 0 : index
    %c0_73 = arith.constant 0 : index
    %160 = vector.load %arg11[%c0_72, %c0_73] : memref<32x64xbf16, #tpu.memory_space<vmem>>, vector<32x64xbf16>
    %cst_74 = arith.constant dense<0.000000e+00> : vector<8x64xf32>
    %161 = tpu.matmul %159, %160, %cst_74 {dimension_numbers = #tpu.dot_dimension_numbers<[1], [0], [0], [1], [0, 0, 1, 1], [], []>} : vector<8x32xbf16>, vector<32x64xbf16>, vector<8x64xf32> -> vector<8x64xf32>
    %162 = arith.addf %158, %161 : vector<8x64xf32>
    %c0_75 = arith.constant 0 : index
    %c0_76 = arith.constant 0 : index
    %163 = vector.load %arg12[%c0_75, %c0_76] : memref<1x64xf32, #tpu.memory_space<vmem>>, vector<1x64xf32>
    %164 = vector.broadcast %163 : vector<1x64xf32> to vector<8x64xf32>
    %165 = arith.addf %162, %164 : vector<8x64xf32>
    %cst_77 = arith.constant dense<0.000000e+00> : vector<64xf32>
    %166 = vector.multi_reduction <add>, %165, %cst_77 [0] : vector<8x64xf32> to vector<64xf32>
    %167 = vector.shape_cast %166 : vector<64xf32> to vector<1x64xf32>
    %cst_78 = arith.constant 1.250000e-01 : f32
    %168 = vector.broadcast %cst_78 : f32 to vector<1x64xf32>
    %169 = arith.mulf %167, %168 : vector<1x64xf32>
    %170 = vector.broadcast %169 : vector<1x64xf32> to vector<8x64xf32>
    %171 = arith.subf %165, %170 : vector<8x64xf32>
    %172 = arith.mulf %171, %171 : vector<8x64xf32>
    %cst_79 = arith.constant dense<0.000000e+00> : vector<64xf32>
    %173 = vector.multi_reduction <add>, %172, %cst_79 [0] : vector<8x64xf32> to vector<64xf32>
    %174 = vector.shape_cast %173 : vector<64xf32> to vector<1x64xf32>
    %cst_80 = arith.constant 1.250000e-01 : f32
    %175 = vector.broadcast %cst_80 : f32 to vector<1x64xf32>
    %176 = arith.mulf %174, %175 : vector<1x64xf32>
    %cst_81 = arith.constant 9.99999974E-6 : f32
    %177 = vector.broadcast %cst_81 : f32 to vector<1x64xf32>
    %178 = arith.addf %176, %177 : vector<1x64xf32>
    %179 = math.rsqrt %178 : vector<1x64xf32>
    %180 = vector.broadcast %179 : vector<1x64xf32> to vector<8x64xf32>
    %181 = arith.mulf %171, %180 : vector<8x64xf32>
    %cst_82 = arith.constant 0.000000e+00 : f32
    %182 = vector.broadcast %cst_82 : f32 to vector<8x64xf32>
    %183 = arith.maximumf %181, %182 : vector<8x64xf32>
    %184 = arith.truncf %183 : vector<8x64xf32> to vector<8x64xbf16>
    %c0_83 = arith.constant 0 : index
    %c0_84 = arith.constant 0 : index
    %185 = vector.load %arg13[%c0_83, %c0_84] : memref<64x32xbf16, #tpu.memory_space<vmem>>, vector<64x32xbf16>
    %cst_85 = arith.constant dense<0.000000e+00> : vector<8x32xf32>
    %186 = tpu.matmul %184, %185, %cst_85 {dimension_numbers = #tpu.dot_dimension_numbers<[1], [0], [0], [1], [0, 0, 1, 1], [], []>} : vector<8x64xbf16>, vector<64x32xbf16>, vector<8x32xf32> -> vector<8x32xf32>
    %c0_86 = arith.constant 0 : index
    %c0_87 = arith.constant 0 : index
    %187 = vector.load %arg14[%c0_86, %c0_87] : memref<1x32xf32, #tpu.memory_space<vmem>>, vector<1x32xf32>
    %188 = vector.broadcast %187 : vector<1x32xf32> to vector<8x32xf32>
    %189 = arith.addf %186, %188 : vector<8x32xf32>
    %190 = arith.addf %1, %189 : vector<8x32xf32>
    %c0_88 = arith.constant 0 : index
    %c0_89 = arith.constant 0 : index
    %c0_90 = arith.constant 0 : index
    %191 = vector.load %arg15[%c0_88, %c0_89, %c0_90] : memref<1x8x32xf32, #tpu.memory_space<vmem>>, vector<1x8x32xf32>
    %192 = vector.shape_cast %191 : vector<1x8x32xf32> to vector<8x32xf32>
    %193 = vector.shape_cast %190 : vector<8x32xf32> to vector<1x8x32xf32>
    tpu.vector_store %arg15[%c0_88, %c0_89, %c0_90], %193 {strides = array<i32>} : memref<1x8x32xf32, #tpu.memory_space<vmem>>, vector<1x8x32xf32>,
    return
  }
  func.func @transform_0(%arg0: i32, %arg1: memref<4xi32, #tpu.memory_space<smem>>) -> (i32, i32, i32) {
    %c0_i32 = arith.constant 0 : i32
    %c0_i32_0 = arith.constant 0 : i32
    %c0_i32_1 = arith.constant 0 : i32
    return %arg0, %c0_i32, %c0_i32_0 : i32, i32, i32
  }
  func.func @transform_1(%arg0: i32, %arg1: memref<4xi32, #tpu.memory_space<smem>>) -> (i32, i32, i32) {
    %0 = arith.index_cast %arg0 : i32 to index
    %1 = memref.load %arg1[%0] : memref<4xi32, #tpu.memory_space<smem>>
    %c0_i32 = arith.constant 0 : i32
    %c0_i32_0 = arith.constant 0 : i32
    %c0_i32_1 = arith.constant 0 : i32
    return %1, %c0_i32, %c0_i32_0 : i32, i32, i32
  }
  func.func @transform_2(%arg0: i32, %arg1: memref<4xi32, #tpu.memory_space<smem>>) -> (i32, i32) {
    %c0_i32 = arith.constant 0 : i32
    %c0_i32_0 = arith.constant 0 : i32
    %c0_i32_1 = arith.constant 0 : i32
    return %c0_i32, %c0_i32_0 : i32, i32
  }
  func.func @transform_3(%arg0: i32, %arg1: memref<4xi32, #tpu.memory_space<smem>>) -> (i32, i32) {
    %c0_i32 = arith.constant 0 : i32
    %c0_i32_0 = arith.constant 0 : i32
    %c0_i32_1 = arith.constant 0 : i32
    return %c0_i32, %c0_i32_0 : i32, i32
  }
  func.func @transform_4(%arg0: i32, %arg1: memref<4xi32, #tpu.memory_space<smem>>) -> (i32, i32) {
    %c0_i32 = arith.constant 0 : i32
    %c0_i32_0 = arith.constant 0 : i32
    %c0_i32_1 = arith.constant 0 : i32
    return %c0_i32, %c0_i32_0 : i32, i32
  }
  func.func @transform_5(%arg0: i32, %arg1: memref<4xi32, #tpu.memory_space<smem>>) -> (i32, i32) {
    %c0_i32 = arith.constant 0 : i32
    %c0_i32_0 = arith.constant 0 : i32
    %c0_i32_1 = arith.constant 0 : i32
    return %c0_i32, %c0_i32_0 : i32, i32
  }
  func.func @transform_6(%arg0: i32, %arg1: memref<4xi32, #tpu.memory_space<smem>>) -> (i32, i32) {
    %c0_i32 = arith.constant 0 : i32
    %c0_i32_0 = arith.constant 0 : i32
    %c0_i32_1 = arith.constant 0 : i32
    return %c0_i32, %c0_i32_0 : i32, i32
  }
  func.func @transform_7(%arg0: i32, %arg1: memref<4xi32, #tpu.memory_space<smem>>) -> (i32, i32) {
    %c0_i32 = arith.constant 0 : i32
    %c0_i32_0 = arith.constant 0 : i32
    %c0_i32_1 = arith.constant 0 : i32
    return %c0_i32, %c0_i32_0 : i32, i32
  }
  func.func @transform_8(%arg0: i32, %arg1: memref<4xi32, #tpu.memory_space<smem>>) -> (i32, i32) {
    %c0_i32 = arith.constant 0 : i32
    %c0_i32_0 = arith.constant 0 : i32
    %c0_i32_1 = arith.constant 0 : i32
    return %c0_i32, %c0_i32_0 : i32, i32
  }
  func.func @transform_9(%arg0: i32, %arg1: memref<4xi32, #tpu.memory_space<smem>>) -> (i32, i32) {
    %c0_i32 = arith.constant 0 : i32
    %c0_i32_0 = arith.constant 0 : i32
    %c0_i32_1 = arith.constant 0 : i32
    return %c0_i32, %c0_i32_0 : i32, i32
  }
  func.func @transform_10(%arg0: i32, %arg1: memref<4xi32, #tpu.memory_space<smem>>) -> (i32, i32) {
    %c0_i32 = arith.constant 0 : i32
    %c0_i32_0 = arith.constant 0 : i32
    %c0_i32_1 = arith.constant 0 : i32
    return %c0_i32, %c0_i32_0 : i32, i32
  }
  func.func @transform_11(%arg0: i32, %arg1: memref<4xi32, #tpu.memory_space<smem>>) -> (i32, i32) {
    %c0_i32 = arith.constant 0 : i32
    %c0_i32_0 = arith.constant 0 : i32
    %c0_i32_1 = arith.constant 0 : i32
    return %c0_i32, %c0_i32_0 : i32, i32
  }
  func.func @transform_12(%arg0: i32, %arg1: memref<4xi32, #tpu.memory_space<smem>>) -> (i32, i32) {
    %c0_i32 = arith.constant 0 : i32
    %c0_i32_0 = arith.constant 0 : i32
    %c0_i32_1 = arith.constant 0 : i32
    return %c0_i32, %c0_i32_0 : i32, i32
  }
  func.func @transform_13(%arg0: i32, %arg1: memref<4xi32, #tpu.memory_space<smem>>) -> (i32, i32, i32) {
    %c0_i32 = arith.constant 0 : i32
    %c0_i32_0 = arith.constant 0 : i32
    %c0_i32_1 = arith.constant 0 : i32
    return %arg0, %c0_i32, %c0_i32_0 : i32, i32, i32
  }
}

</mosaic_0001>

<bundles_post_ra>
// kernel: attentional_gnn_forward.3
= control target key start
LH: loop header
LB: loop body
LE: loop exit
PB: predicated region body
PF: predicated region fallthrough
CT: control target
= control target key end

     0   :  { %s2033_s0 = inlined_call_operand.vmem [shape: s32[4], index: 0, kind: input, shape index: {}]   ;;  %s2034_s1 = inlined_call_operand.vmem [shape: f32[4,8,32], index: 1, kind: input, shape index: {}, may-alias: {1,2}]   ;;  %s2035_s2 = inlined_call_operand.vmem [shape: f32[4,8,32], index: 2, kind: input, shape index: {}, may-alias: {1,2}]   ;;  %s2036_s3 = inlined_call_operand.vmem [shape: bf16[32,32], index: 3, kind: input, shape index: {}]   ;;  %s2037_s4 = inlined_call_operand.vmem [shape: f32[1,32], index: 4, kind: input, shape index: {}]   ;;  %s2038_s5 = inlined_call_operand.vmem [shape: bf16[32,64], index: 5, kind: input, shape index: {}]   ;;  %s2039_s6 = inlined_call_operand.vmem [shape: f32[1,64], index: 6, kind: input, shape index: {}]   ;;  %s2040_s7 = inlined_call_operand.vmem [shape: bf16[32,32], index: 7, kind: input, shape index: {}]   ;;  %s2041_s8 = inlined_call_operand.vmem [shape: f32[1,32], index: 8, kind: input, shape index: {}]   ;;  %s2042_s9 = inlined_call_operand.vmem [shape: bf16[32,64], index: 9, kind: input, shape index: {}]   ;;  %s2043_s10 = inlined_call_operand.vmem [shape: bf16[32,64], index: 10, kind: input, shape index: {}]   ;;  %s2044_s11 = inlined_call_operand.vmem [shape: f32[1,64], index: 11, kind: input, shape index: {}]   ;;  %s2045_s12 = inlined_call_operand.vmem [shape: bf16[64,32], index: 12, kind: input, shape index: {}]   ;;  %s2046_s13 = inlined_call_operand.vmem [shape: f32[1,32], index: 13, kind: input, shape index: {}]   ;;  %s2047_s14 = inlined_call_operand.vmem [shape: f32[4,8,32], index: 14, kind: output, shape index: {}]  }
   0x1   :  { %s19_s15 = sshll.u32 %s2033_s0, 4  ;;  %s20_s15 = int_to_ptr.vmem [resolvable:$true] %s19_s15 }
   0x2   :  { %s1736_s16 = scalar_lea.vmem %s20_s15, 16  ;;  %p1741_p1 = scmp.lt.s32.totalorder %s20_s15, %s20_s15 }
   0x3   :  { %p1737_p0 = scmp.ne.s32.totalorder %s20_s15, %s1736_s16  ;;  %p1742_p2 = scmp.lt.s32.totalorder %s1736_s16, %s1736_s16 }
   0x5   :  { %p1743_p3 = por %p1742_p2, %p1741_p1 }
   0x7   :  { %p1744_p4 = pnand %p1743_p3, %p1737_p0 }
   0x9   :  { %1747 = shalt.err (!%p1744_p4)  }
   0xa   :  { %s1758_s17 = smov [#allocation5]  }
   0xb   :  { %22 = dma.vmem_to_smem %s20_s15, 16, %s1758_s17, [#allocation4] }
   0xc   :  { %1752 = dma.done.wait [#allocation4], 16 }
   0xd   :  { %1753 = vsyncadd [#allocation4], 4294967280 }
   0xe   :  { %24 = sfence }
   0xf   :  { %s1849_s18 = smov 0  }
  0x10 LB: > { %s1482_s0 = sadd.s32 4294967295, %s1756_s18   ;;  %p1486_p5 = scmp.ge.s32.totalorder %s1756_s18, 1  ;;  %s1756_s18 = sphi %s1849_s18, %s30_s18  }
  0x11   : > { %p406_p6 = scmp.lt.s32.totalorder %s1756_s18, 5 }
  0x13   : > { %p407_p7 = pnand %p1486_p5, %p406_p6 }
  0x14   : > { %s457_s23 = sld [smem:[#allocation5 + %s1482_s0]] (!%p407_p7)  ;;  %p453_p8 = scmp.lt.s32.totalorder (!%p407_p7), %s1482_s0, 3 }
  0x15   : > { %410 = sbr.rel (%p407_p7) target bundleno = 1708 (0x6ac), region = 72  ;;  %s1761_s25 = smov (!%p407_p7), 112  }
  0x16   : > { %s1762_s26 = smov (!%p407_p7), 120   ;;  %s1763_s27 = smov (!%p407_p7), 104  }
  0x17   : > { %s1764_s29 = smov (!%p407_p7), 96   ;;  %s1765_s30 = smov (!%p407_p7), 80  }
  0x18   : > { %s1768_s17 = smov (!%p407_p7), 8  }
  0x1a   : > { %v1692_v0 = vld [vmem:[%s2038_s5 + $0x8] sm:$0xff]   ;;  %v1759_v1 = vmov 0.0   ;;  %v1693_v2 = vld [vmem:[%s2038_s5] sm:$0xff]   ;;  %vm1760_vm0 = vmmov 0   ;;  %s2049_s0 = smov (!%p453_p8, %s1482_s0), 3  ;;  %p458_p9 = scmp.lt.s32.totalorder %s457_s23, 3 }
  0x1b   : > { %1579 = vmatprep.subr.bf16.mxu1 %v1759_v1  ;;  %1571 = vmatprep.subr.bf16.mxu0 %v1759_v1  ;;  %v1694_v3 = vld [vmem:[%s2036_s3 + $0x8] sm:$0xff]   ;;  %v1695_v4 = vld [vmem:[%s2036_s3] sm:$0xff]   ;;  %s1487_s28 = sshll.u32 %s2049_s0, 3  ;;  %vm495_vm1 = vcmask 261120   ;;  %vm607_vm2 = vcmask 519168   ;;  %vm610_vm3 = vcmask 64512  }
  0x1c   : > { %1580 = vmatpush3.bf16.msra.mxu1 %v1692_v0  ;;  %1583 = vmatprep.mubr.msk.bf16.mxu1 %vm1760_vm0, %v1759_v1  ;;  %s456_s15 = scalar_lea.vmem %s2034_s1, %s1487_s28  ;;  %s2051_s23 = smov (!%p458_p9, %s457_s23), 3  ;;  %v1494_v11 = vld [vmem:[%s2039_s6] ss:$0 sm:$0xff]  ;;  %vm680_vm4 = vcmask 1043456   ;;  %vm728_vm5 = vcmask 60416   ;;  %vm858_vm6 = vcmask 126016  }
  0x1d   : > { %1581 = vmatprep.subr.bf16.mxu1 %v1759_v1  ;;  %1575 = vmatprep.mubr.msk.bf16.mxu0 %vm1760_vm0, %v1759_v1  ;;  %v1886_v5 = vld [vmem:[%s456_s15] sm:$0xff]  ;;  %s1488_s16 = sshll.u32 %s2051_s23, 3  ;;  %s1766_s15 = smov 72   ;;  %vm987_vm7 = vcmask 191616   ;;  %vm1116_vm8 = vcmask 257216   ;;  %vm1309_vm9 = vcmask 523264  }
  0x1e   : > { %1572 = vmatpush3.bf16.msra.mxu0 %v1694_v3  ;;  %v1890_v6 = vpack.c.bf16 %v1886_v5, %v1886_v5  ;;  %s461_s20 = scalar_lea.vmem %s2035_s2, %s1488_s16  ;;  %v1490_v20 = vld [vmem:[%s2037_s4] ss:$0 sm:$0xff]  ;;  %s1767_s16 = smov 88  }
  0x1f   : > { %1573 = vmatprep.subr.bf16.mxu0 %v1759_v1  ;;  %v470_v7 = vld [vmem:[%s461_s20] sm:$0xff]  ;;  %s1769_s23 = smov 16   ;;  %s466_s21 = scalar_lea.vmem %s2047_s14, %s1487_s28 }
  0x20   : > { %1582 = vmatpush3.bf16.msra.mxu1 %v1693_v2  ;;  %v471_v8 = vpack.c.bf16 %v470_v7, %v470_v7 }
  0x21   : > { %1593 = vmatprep.subr.bf16.mxu1 %v1759_v1 }
  0x22   : > { %1574 = vmatpush3.bf16.msra.mxu0 %v1695_v4 }
  0x23   : > { %1587 = vmatprep.subr.bf16.mxu0 %v1759_v1  ;;  %1584 = vmatmul.mubr.msk.bf16.vlgmr.msra.gmra.mxu1 %vm495_vm1, %v471_v8 }
  0x24   : > { %1595 = vmatprep.mubr.msk.bf16.mxu1 %vm1760_vm0, %v1759_v1 }
  0x25   : > { %1576 = vmatmul.mubr.msk.bf16.vlgmr.msra.gmra.mxu0 %vm495_vm1, %v1890_v6 }
  0x26   : > { %1589 = vmatprep.mubr.msk.bf16.mxu0 %vm1760_vm0, %v1759_v1 }
  0xe3   : > { %v600_v13 = vpop.f32.mrf.mxu1 }
  0xe4   : > { %v601_v14 = vadd.f32 %v1494_v11, %v600_v13 }
  0xe5   : > { %v533_v9 = vpop.f32.mrf.mxu0  ;;  %v1585_v16 = vpop.f32.mrf.mxu1 }
  0xe6   : > { %v606_v17 = vpack.c.bf16 %v601_v14, %v601_v14  ;;  %v534_v21 = vadd.f32 %v1490_v20, %v533_v9 }
  0xe7   : > { %v1577_v10 = vpop.f32.mrf.mxu0  ;;  %v603_v18 = vpop.f32.mrf.mxu1 }
  0xe8   : > { %608 = vst.msk [vmem:[#allocation2] sm:$0xf] %vm607_vm2, %v606_v17  ;;  %v539_v26 = vpack.c.bf16 %v534_v21, %v534_v21 }
  0xe9   : > { %v536_v12 = vpop.f32.mrf.mxu0  ;;  %v1586_v19 = vpop.f32.mrf.mxu1 }
  0xeb   : > { %v1578_v15 = vpop.f32.mrf.mxu0 }
  0xef   : > { %v609_v22 = vld [vmem:[#allocation2] sm:$0xf] }
  0xf0   : > { %v1909_v23 = vld [vmem:[#allocation2] ss:$0 sps:$4 sm:$0xff]   ;;  %v615_v24 = vsel %vm610_vm3, %v609_v22, 0  ;;  %v1499_v28 = vcombine.low %v609_v22, %v609_v22 }
  0xf1   : > { %v1912_v25 = vld [vmem:[#allocation2] ss:$0 sps:$4 sm:$0xff]   ;;  %1588 = vmatpush3.bf16.xpose.msra.mxu0 %v615_v24  ;;  %866 = vrot.lane.b32.xlu1 %v1909_v23, %s1761_s25 }
  0xf2   : > { %737 = vrot.lane.b32.xlu0 %v1912_v25, %s1762_s26  ;;  %1599 = vmatprep.subr.bf16.mxu0 %v1759_v1  ;;  %v1698_v27 = vld [vmem:[#allocation2] ss:$0 sps:$4 sm:$0xff]  }
  0xf5   : > { %861 = vrot.lane.b32.xlu1 %v539_v26, %s1761_s25 }
  0xf6   : > { %732 = vrot.lane.b32.xlu0 %v539_v26, %s1762_s26  ;;  %s1770_s26 = smov 24  }
  0xf8   : > { %1590 = vmatmul.mubr.msk.bf16.vlgmr.msra.gmra.mxu0 %vm610_vm3, %v539_v26 }
  0xf9   : > { %990 = vrot.lane.b32.xlu1 %v539_v26, %s1763_s27  ;;  %1601 = vmatprep.mubr.msk.bf16.mxu0 %vm1760_vm0, %v1759_v1 }
  0xfa   : > { %995 = vrot.lane.b32.xlu0 %v1698_v27, %s1763_s27 }
  0xfd   : > { %675 = vrot.lane.b32.xlu1 %v1499_v28, %s1764_s29 }
 0x163   : > { %v867_v29 = vpop.permute.xlu1 %866 }
 0x164   : > { %v738_v30 = vpop.permute.xlu0 %737  ;;  %v872_v35 = vsel %vm610_vm3, %v867_v29, 0 }
 0x165   : > { %v743_v31 = vsel %vm610_vm3, %v738_v30, 0 }
 0x166   : > { %1600 = vmatpush3.bf16.xpose.msra.mxu0 %v743_v31 }
 0x167   : > { %v862_v32 = vpop.permute.xlu1 %861  ;;  %1611 = vmatprep.subr.bf16.mxu0 %v1759_v1 }
 0x168   : > { %v733_v34 = vpop.permute.xlu0 %732 }
 0x16b   : > { %v991_v33 = vpop.permute.xlu1 %990 }
 0x16c   : > { %v996_v38 = vpop.permute.xlu0 %995 }
 0x16d   : > { %1602 = vmatmul.mubr.msk.bf16.vlgmr.msra.gmra.mxu0 %vm610_vm3, %v733_v34  ;;  %v1001_v39 = vsel %vm610_vm3, %v996_v38, 0 }
 0x16e   : > { %1612 = vmatpush3.bf16.xpose.msra.mxu0 %v872_v35  ;;  %1613 = vmatprep.mubr.msk.bf16.mxu0 %vm1760_vm0, %v1759_v1 }
 0x16f   : > { %v676_v36 = vpop.permute.xlu1 %675  ;;  %1623 = vmatprep.subr.bf16.mxu0 %v1759_v1 }
 0x170   : > { %v682_v37 = vsel %vm680_vm4, %v676_v36, 0 }
 0x171   : > { %1594 = vmatpush3.bf16.msra.mxu1 %v682_v37 }
 0x172   : > { %1605 = vmatprep.subr.bf16.mxu1 %v1759_v1 }
 0x175   : > { %1614 = vmatmul.mubr.msk.bf16.vlgmr.msra.gmra.mxu0 %vm610_vm3, %v862_v32 }
 0x176   : > { %1624 = vmatpush3.bf16.xpose.msra.mxu0 %v1001_v39  ;;  %1625 = vmatprep.mubr.msk.bf16.mxu0 %vm1760_vm0, %v1759_v1 }
 0x177   : > { %1635 = vmatprep.subr.bf16.mxu0 %v1759_v1 }
 0x17d   : > { %1626 = vmatmul.mubr.msk.bf16.vlgmr.msra.gmra.mxu0 %vm610_vm3, %v991_v33 }
 0x17e   : > { %1639 = vmatprep.mubr.msk.bf16.mxu0 %vm1760_vm0, %v1759_v1 }
 0x1b8   : > { %v651_v40 = vpop.f32.mrf.mxu0 }
 0x1b9   : > { %v657_v41 = vsel %vm610_vm3, %v651_v40, -inf }
 0x1ba   : > { %658 = vmax.xlane.f32.xlu0 %v657_v41  ;;  %v1591_v42 = vpop.f32.mrf.mxu0 }
 0x1bc   : > { %v654_v43 = vpop.f32.mrf.mxu0 }
 0x1be   : > { %v1592_v44 = vpop.f32.mrf.mxu0 }
 0x22d   : > { %v779_v45 = vpop.f32.mrf.mxu0 }
 0x22e   : > { %v785_v46 = vsel %vm610_vm3, %v779_v45, -inf }
 0x22f   : > { %786 = vmax.xlane.f32.xlu1 %v785_v46  ;;  %v1603_v47 = vpop.f32.mrf.mxu0 }
 0x231   : > { %v782_v48 = vpop.f32.mrf.mxu0 }
 0x233   : > { %v1604_v49 = vpop.f32.mrf.mxu0 }
 0x235   : > { %v908_v50 = vpop.f32.mrf.mxu0 }
 0x236   : > { %v914_v51 = vsel %vm610_vm3, %v908_v50, -inf }
 0x237   : > { %915 = vmax.xlane.f32.xlu0 %v914_v51  ;;  %v1615_v52 = vpop.f32.mrf.mxu0 }
 0x239   : > { %v911_v53 = vpop.f32.mrf.mxu0 }
 0x23b   : > { %v1616_v54 = vpop.f32.mrf.mxu0 }
 0x23d   : > { %v1037_v55 = vpop.f32.mrf.mxu0 }
 0x23e   : > { %v1043_v56 = vsel %vm610_vm3, %v1037_v55, -inf }
 0x23f   : > { %1044 = vmax.xlane.f32.xlu0 %v1043_v56  ;;  %v1627_v57 = vpop.f32.mrf.mxu0 }
 0x240   : > { %929 = vrot.lane.b32.xlu1 %v1909_v23, %s1765_s30 }
 0x241   : > { %v1040_v58 = vpop.f32.mrf.mxu0 }
 0x243   : > { %v659_v59 = vpop.xlane.xlu0 %658  ;;  %v1628_v60 = vpop.f32.mrf.mxu0 }
 0x244   : > { %v663_v61 = vsub.f32 %v651_v40, %v659_v59  ;;  %1058 = vrot.lane.b32.xlu1 %v1698_v27, %s1766_s15  ;;  %v660_v33 = vsub.f32 -inf, %v659_v59 }
 0x246   : > { %v664_v62 = vmul.f32 1.442695, %v663_v61  ;;  %v661_v34 = vmul.f32 1.442695, %v660_v33  ;;  %v1705_v33 = vld [vmem:[%s2043_s10] sm:$0xff]  }
 0x248   : > { %1710 = vpow2.f32 %v664_v62 }
 0x255   : > { %800 = vrot.lane.b32.xlu0 %v1912_v25, %s1767_s16  ;;  %v1711_v63 = vpop.eup %1710 }
 0x256   : > { %v666_v0 = vpack.c.bf16 %v1711_v63, %v1711_v63  ;;  %v668_v28 = vsel %vm610_vm3, %v1711_v63, 0.0 }
 0x258   : > { %1596 = vmatmul.mubr.msk.bf16.vlgmr.msra.gmra.mxu1 %vm610_vm3, %v666_v0 }
 0x259   : > { %1607 = vmatprep.mubr.msk.bf16.mxu1 %vm1760_vm0, %v1759_v1 }
 0x2b8   : > { %v787_v2 = vpop.xlane.xlu1 %786 }
 0x2b9   : > { %v791_v3 = vsub.f32 %v779_v45, %v787_v2  ;;  %v788_v38 = vsub.f32 -inf, %v787_v2 }
 0x2bb   : > { %v792_v4 = vmul.f32 1.442695, %v791_v3  ;;  %v789_v42 = vmul.f32 1.442695, %v788_v38 }
 0x2bc   : > { %v930_v17 = vpop.permute.xlu1 %929 }
 0x2bd   : > { %1712 = vpow2.f32 %v792_v4  ;;  %v935_v19 = vsel %vm680_vm4, %v930_v17, 0 }
 0x2c0   : > { %v916_v7 = vpop.xlane.xlu0 %915  ;;  %v1059_v22 = vpop.permute.xlu1 %1058 }
 0x2c1   : > { %v920_v8 = vsub.f32 %v908_v50, %v916_v7  ;;  %v1064_v24 = vsel %vm680_vm4, %v1059_v22, 0  ;;  %v917_v43 = vsub.f32 -inf, %v916_v7 }
 0x2c3   : > { %v921_v9 = vmul.f32 1.442695, %v920_v8  ;;  %v918_v44 = vmul.f32 1.442695, %v917_v43 }
 0x2c5   : > { %1714 = vpow2.f32 %v921_v9 }
 0x2c8   : > { %v1045_v10 = vpop.xlane.xlu0 %1044 }
 0x2c9   : > { %v1049_v11 = vsub.f32 %v1037_v55, %v1045_v10  ;;  %v1046_v45 = vsub.f32 -inf, %v1045_v10 }
 0x2ca   : > { %v1713_v12 = vpop.eup %1712 }
 0x2cb   : > { %v1050_v13 = vmul.f32 1.442695, %v1049_v11  ;;  %v796_v14 = vsel %vm610_vm3, %v1713_v12, 0.0  ;;  %v794_v18 = vpack.c.bf16 %v1713_v12, %v1713_v12  ;;  %v1047_v49 = vmul.f32 1.442695, %v1046_v45  ;;  %v1700_v12 = vld [vmem:[%s2040_s7 + $0x8] sm:$0xff]  }
 0x2cc   : > { %v801_v15 = vpop.permute.xlu0 %800  ;;  %797 = vadd.xlane.f32.xlu0 %v796_v14  ;;  %1636 = vmatpush3.bf16.msra.mxu0 %v1700_v12  ;;  %v1707_v45 = vld [vmem:[%s2045_s12 + $0x10] sm:$0xff]  }
 0x2cd   : > { %v806_v16 = vsel %vm680_vm4, %v801_v15, 0  ;;  %1716 = vpow2.f32 %v1050_v13  ;;  %v1701_v15 = vld [vmem:[%s2040_s7] sm:$0xff]   ;;  %1637 = vmatprep.subr.bf16.mxu0 %v1759_v1 }
 0x2ce   : > { %1606 = vmatpush3.bf16.msra.mxu1 %v806_v16  ;;  %1718 = vpow2.f32 %v661_v34  ;;  %v1513_v34 = vld [vmem:[%s2041_s8] ss:$0 sm:$0xff] }
 0x2cf   : > { %1617 = vmatprep.subr.bf16.mxu1 %v1759_v1 }
 0x2d0   : > { %1638 = vmatpush3.bf16.msra.mxu0 %v1701_v15 }
 0x2d1   : > { %1608 = vmatmul.mubr.msk.bf16.vlgmr.msra.gmra.mxu1 %vm610_vm3, %v794_v18  ;;  %1651 = vmatprep.subr.bf16.mxu0 %v1759_v1 }
 0x2d2   : > { %1618 = vmatpush3.bf16.msra.mxu1 %v935_v19  ;;  %1619 = vmatprep.mubr.msk.bf16.mxu1 %vm1760_vm0, %v1759_v1  ;;  %v1715_v20 = vpop.eup %1714 }
 0x2d3   : > { %1629 = vmatprep.subr.bf16.mxu1 %v1759_v1  ;;  %v925_v21 = vsel %vm610_vm3, %v1715_v20, 0.0  ;;  %v923_v23 = vpack.c.bf16 %v1715_v20, %v1715_v20 }
 0x2d4   : > { %926 = vadd.xlane.f32.xlu1 %v925_v21 }
 0x2d9   : > { %1620 = vmatmul.mubr.msk.bf16.vlgmr.msra.gmra.mxu1 %vm610_vm3, %v923_v23  ;;  %v1703_v23 = vld [vmem:[%s2043_s10 + $0x8] sm:$0xff]  }
 0x2da   : > { %1630 = vmatpush3.bf16.msra.mxu1 %v1064_v24  ;;  %1631 = vmatprep.mubr.msk.bf16.mxu1 %vm1760_vm0, %v1759_v1  ;;  %v1717_v25 = vpop.eup %1716 }
 0x2db   : > { %1643 = vmatprep.subr.bf16.mxu1 %v1759_v1  ;;  %v1054_v26 = vsel %vm610_vm3, %v1717_v25, 0.0  ;;  %v1052_v27 = vpack.c.bf16 %v1717_v25, %v1717_v25  ;;  %v1719_v36 = vpop.eup %1718 }
 0x2dc   : > { %1055 = vadd.xlane.f32.xlu0 %v1054_v26  ;;  %v667_v39 = vmul.f32 0.0, %v1719_v36 }
 0x2e0   : > { %669 = vadd.xlane.f32.xlu0 %v668_v28 }
 0x2e1   : > { %1632 = vmatmul.mubr.msk.bf16.vlgmr.msra.gmra.mxu1 %vm610_vm3, %v1052_v27 }
 0x2e2   : > { %1647 = vmatprep.mubr.msk.bf16.mxu1 %vm1760_vm0, %v1759_v1  ;;  %1644 = vmatpush3.bf16.msra.mxu1 %v1703_v23 }
 0x2e3   : > { %1645 = vmatprep.subr.bf16.mxu1 %v1759_v1 }
 0x2e6   : > { %1646 = vmatpush3.bf16.msra.mxu1 %v1705_v33 }
 0x2e7   : > { %1659 = vmatprep.subr.bf16.mxu1 %v1759_v1 }
 0x318   : > { %v718_v29 = vpop.f32.mrf.mxu1 }
 0x319   : > { %v724_v46 = vadd.f32 %v718_v29, %v667_v39 }
 0x31a   : > { %v1597_v30 = vpop.f32.mrf.mxu1 }
 0x31b   : > { %v1702_v30 = vld [vmem:[%s2042_s9 + $0x8] sm:$0xff]  }
 0x31c   : > { %v721_v31 = vpop.f32.mrf.mxu1 }
 0x31e   : > { %v1598_v32 = vpop.f32.mrf.mxu1 }
 0x31f   : > { %v1704_v32 = vld [vmem:[%s2042_s9] sm:$0xff]  }
 0x355   : > { %v798_v35 = vpop.xlane.xlu0 %797 }
 0x35d   : > { %v927_v55 = vpop.xlane.xlu1 %926 }
 0x365   : > { %v1056_v37 = vpop.xlane.xlu0 %1055 }
 0x369   : > { %v670_v40 = vpop.xlane.xlu0 %669 }
 0x36a   : > { %v671_v41 = vadd.f32 %v670_v40, %v667_v39 }
 0x36c   : > { %1720 = vrcp.f32 %v671_v41 }
 0x36d   : > { %1722 = vpow2.f32 %v789_v42 }
 0x36e   : > { %1724 = vpow2.f32 %v918_v44  ;;  %v1706_v44 = vld [vmem:[%s2045_s12 + $0x18] sm:$0xff]  }
 0x36f   : > { %1726 = vpow2.f32 %v1047_v49  ;;  %v1523_v49 = vld [vmem:[%s2044_s11] ss:$0 sm:$0xff] }
 0x379   : > { %v1721_v47 = vpop.eup %1720 }
 0x37a   : > { %v726_v48 = vmul.f32 %v1721_v47, %v724_v46  ;;  %v1723_v50 = vpop.eup %1722  ;;  %v1708_v46 = vld [vmem:[%s2045_s12 + $0x8] sm:$0xff]   ;;  %v1709_v47 = vld [vmem:[%s2045_s12] sm:$0xff]  }
 0x37b   : > { %v795_v52 = vmul.f32 0.0, %v1723_v50  ;;  %v1725_v54 = vpop.eup %1724 }
 0x37c   : > { %v727_v51 = vpack.c.bf16 %v726_v48, %v726_v48  ;;  %v924_v56 = vmul.f32 0.0, %v1725_v54  ;;  %v1727_v58 = vpop.eup %1726 }
 0x37d   : > { %v799_v53 = vadd.f32 %v798_v35, %v795_v52  ;;  %v1053_v59 = vmul.f32 0.0, %v1727_v58 }
 0x37e   : > { %729 = vst.msk [vmem:[#allocation3] sm:$0xf] %vm728_vm5, %v727_v51  ;;  %v928_v57 = vadd.f32 %v927_v55, %v924_v56 }
 0x37f   : > { %1728 = vrcp.f32 %v799_v53  ;;  %v1057_v61 = vadd.f32 %v1056_v37, %v1053_v59 }
 0x380   : > { %1730 = vrcp.f32 %v928_v57 }
 0x381   : > { %1732 = vrcp.f32 %v1057_v61 }
 0x38c   : > { %v1729_v63 = vpop.eup %1728 }
 0x38d   : > { %v1731_v10 = vpop.eup %1730 }
 0x38e   : > { %v1733_v20 = vpop.eup %1732 }
 0x391   : > { %v842_v60 = vpop.f32.mrf.mxu1 }
 0x392   : > { %v848_v62 = vadd.f32 %v842_v60, %v795_v52 }
 0x393   : > { %v1609_v0 = vpop.f32.mrf.mxu1 }
 0x394   : > { %v850_v2 = vmul.f32 %v1729_v63, %v848_v62 }
 0x395   : > { %v845_v3 = vpop.f32.mrf.mxu1 }
 0x396   : > { %v1532_v4 = vpack.c.bf16 %v850_v2, %v850_v2 }
 0x397   : > { %v1610_v7 = vpop.f32.mrf.mxu1 }
 0x398   : > { %855 = vrot.lane.b32.xlu1 %v1532_v4, %s1768_s17 }
 0x399   : > { %v971_v8 = vpop.f32.mrf.mxu1 }
 0x39a   : > { %v977_v9 = vadd.f32 %v971_v8, %v924_v56 }
 0x39b   : > { %v1621_v11 = vpop.f32.mrf.mxu1 }
 0x39c   : > { %v979_v13 = vmul.f32 %v1731_v10, %v977_v9 }
 0x39d   : > { %v974_v14 = vpop.f32.mrf.mxu1 }
 0x39e   : > { %v1533_v16 = vpack.c.bf16 %v979_v13, %v979_v13 }
 0x39f   : > { %v1622_v17 = vpop.f32.mrf.mxu1 }
 0x3a0   : > { %984 = vrot.lane.b32.xlu0 %v1533_v16, %s1769_s23  ;;  %v1524_v16 = vld [vmem:[%s2046_s13] ss:$0 sm:$0xff] }
 0x3a1   : > { %v1100_v18 = vpop.f32.mrf.mxu1 }
 0x3a2   : > { %v1106_v19 = vadd.f32 %v1100_v18, %v1053_v59 }
 0x3a3   : > { %v1633_v21 = vpop.f32.mrf.mxu1 }
 0x3a4   : > { %v1108_v22 = vmul.f32 %v1733_v20, %v1106_v19 }
 0x3a5   : > { %v1103_v24 = vpop.f32.mrf.mxu1 }
 0x3a6   : > { %v1534_v25 = vpack.c.bf16 %v1108_v22, %v1108_v22 }
 0x3a7   : > { %v1634_v26 = vpop.f32.mrf.mxu1 }
 0x3a8   : > { %1113 = vrot.lane.b32.xlu1 %v1534_v25, %s1770_s26 }
 0x40a   : > { %v856_v27 = vpop.permute.xlu1 %855 }
 0x40b   : > { %859 = vst.msk [vmem:[#allocation3] sm:$0xf] %vm858_vm6, %v856_v27 }
 0x412   : > { %v985_v28 = vpop.permute.xlu0 %984 }
 0x413   : > { %988 = vst.msk [vmem:[#allocation3] sm:$0xf] %vm987_vm7, %v985_v28 }
 0x41a   : > { %v1114_v29 = vpop.permute.xlu1 %1113 }
 0x41b   : > { %1117 = vst.msk [vmem:[#allocation3] sm:$0xf] %vm1116_vm8, %v1114_v29 }
 0x422   : > { %v1118_v31 = vld [vmem:[#allocation3] sm:$0xf] }
 0x423   : > { %1640 = vmatmul.mubr.msk.bf16.vlgmr.msra.gmra.mxu0 %vm495_vm1, %v1118_v31 }
 0x424   : > { %1652 = vmatpush3.bf16.msra.mxu0 %v1702_v30  ;;  %1655 = vmatprep.mubr.msk.bf16.mxu0 %vm1760_vm0, %v1759_v1 }
 0x425   : > { %1653 = vmatprep.subr.bf16.mxu0 %v1759_v1 }
 0x428   : > { %1654 = vmatpush3.bf16.msra.mxu0 %v1704_v32 }
 0x42b   : > { %1656 = vmatmul.mubr.msk.bf16.vlgmr.msra.gmra.mxu0 %vm495_vm1, %v1890_v6 }
 0x4e3   : > { %v1179_v35 = vpop.f32.mrf.mxu0 }
 0x4e4   : > { %v1180_v36 = vadd.f32 %v1513_v34, %v1179_v35 }
 0x4e5   : > { %v1641_v37 = vpop.f32.mrf.mxu0 }
 0x4e6   : > { %v1189_v38 = vpack.c.bf16 %v1180_v36, %v1180_v36 }
 0x4e7   : > { %v1182_v39 = vpop.f32.mrf.mxu0 }
 0x4e8   : > { %1648 = vmatmul.mubr.msk.bf16.vlgmr.msra.gmra.mxu1 %vm495_vm1, %v1189_v38 }
 0x4e9   : > { %v1642_v40 = vpop.f32.mrf.mxu0  ;;  %1667 = vmatprep.mubr.msk.bf16.mxu1 %vm1760_vm0, %v1759_v1  ;;  %1660 = vmatpush3.bf16.msra.mxu1 %v1706_v44 }
 0x4ea   : > { %1661 = vmatprep.subr.bf16.mxu1 %v1759_v1 }
 0x4eb   : > { %v1295_v6 = vpop.f32.mrf.mxu0 }
 0x4ed   : > { %v1657_v41 = vpop.f32.mrf.mxu0  ;;  %1662 = vmatpush3.bf16.msra.mxu1 %v1707_v45 }
 0x4ee   : > { %1663 = vmatprep.subr.bf16.mxu1 %v1759_v1 }
 0x4ef   : > { %v1298_v42 = vpop.f32.mrf.mxu0 }
 0x4f1   : > { %v1658_v43 = vpop.f32.mrf.mxu0  ;;  %1664 = vmatpush3.bf16.msra.mxu1 %v1708_v46 }
 0x4f2   : > { %1665 = vmatprep.subr.bf16.mxu1 %v1759_v1 }
 0x4f5   : > { %1666 = vmatpush3.bf16.msra.mxu1 %v1709_v47 }
 0x5a8   : > { %v1243_v48 = vpop.f32.mrf.mxu1 }
 0x5a9   : > { %v1296_v50 = vadd.f32 %v1295_v6, %v1243_v48 }
 0x5aa   : > { %v1649_v51 = vpop.f32.mrf.mxu1 }
 0x5ab   : > { %v1308_v52 = vadd.f32 %v1523_v49, %v1296_v50 }
 0x5ac   : > { %v1246_v53 = vpop.f32.mrf.mxu1 }
 0x5ad   : > { %v1310_v54 = vsel %vm1309_vm9, %v1308_v52, 0.0 }
 0x5ae   : > { %v1311_v55 = vrot.slane %v1310_v54, 4  ;;  %v1650_v56 = vpop.f32.mrf.mxu1 }
 0x5b0   : > { %v1312_v1 = vadd.f32 %v1311_v55, %v1310_v54 }
 0x5b2   : > { %v1313_v57 = vrot.slane %v1312_v1, 2 }
 0x5b4   : > { %v1314_v58 = vadd.f32 %v1313_v57, %v1312_v1 }
 0x5b6   : > { %v1315_v59 = vrot.slane %v1314_v58, 1 }
 0x5b8   : > { %v1316_v60 = vadd.f32 %v1315_v59, %v1314_v58 }
 0x5ba   : > { %v1317_v61 = vmul.f32 0.125, %v1316_v60 }
 0x5bc   : > { %v1318_v62 = vsub.f32 %v1308_v52, %v1317_v61 }
 0x5be   : > { %v1319_v63 = vmul.f32 %v1318_v62, %v1318_v62 }
 0x5c0   : > { %v1320_v0 = vsel %vm1309_vm9, %v1319_v63, 0.0 }
 0x5c1   : > { %v1321_v2 = vrot.slane %v1320_v0, 4 }
 0x5c3   : > { %v1322_v3 = vadd.f32 %v1321_v2, %v1320_v0 }
 0x5c5   : > { %v1323_v4 = vrot.slane %v1322_v3, 2 }
 0x5c7   : > { %v1324_v7 = vadd.f32 %v1323_v4, %v1322_v3 }
 0x5c9   : > { %v1325_v8 = vrot.slane %v1324_v7, 1 }
 0x5cb   : > { %v1326_v9 = vadd.f32 %v1325_v8, %v1324_v7 }
 0x5cd   : > { %v1327_v10 = vmul.f32 0.125, %v1326_v9 }
 0x5cf   : > { %v1328_v11 = vadd.f32 1e-05, %v1327_v10 }
 0x5d1   : > { %1734 = vrsqrt.f32 %v1328_v11 }
 0x5de   : > { %v1735_v12 = vpop.eup %1734 }
 0x5df   : > { %v1330_v13 = vmul.f32 %v1735_v12, %v1318_v62 }
 0x5e1   : > { %v1331_v14 = vmax.f32 %v1330_v13, 0.0 }
 0x5e3   : > { %v1332_v15 = vpack.c.bf16 %v1331_v14, %v1331_v14 }
 0x5e5   : > { %1668 = vmatmul.mubr.msk.bf16.vlgmr.msra.gmra.mxu1 %vm1309_vm9, %v1332_v15 }
 0x6a5   : > { %v1409_v17 = vpop.f32.mrf.mxu1 }
 0x6a6   : > { %v1410_v18 = vadd.f32 %v1524_v16, %v1409_v17 }
 0x6a7   : > { %v1669_v19 = vpop.f32.mrf.mxu1 }
 0x6a8   : > { %v1415_v20 = vadd.f32 %v1410_v18, %v1886_v5 }
 0x6a9   : > { %v1412_v21 = vpop.f32.mrf.mxu1 }
 0x6aa   : > { %1416 = vst.msk [vmem:[%s466_s21] sm:$0xff] %vm495_vm1, %v1415_v20 }
 0x6ab   : > { %v1670_v22 = vpop.f32.mrf.mxu1 }
 0x6ac PF: > { %s30_s18 = sadd.s32 1, %s1756_s18  }
 0x6ad   : > { %p27_p10 = scmp.ge.s32.totalorder %s30_s18, 6  }
 0x6af   :  { %29 = sbr.rel (!%p27_p10) target bundleno = 16 (0x10), region = 105 }

// kernel: attentional_gnn_forward.2
= control target key start
LH: loop header
LB: loop body
LE: loop exit
PB: predicated region body
PF: predicated region fallthrough
CT: control target
= control target key end

     0   :  { %s2033_s0 = inlined_call_operand.vmem [shape: s32[4], index: 0, kind: input, shape index: {}]   ;;  %s2034_s1 = inlined_call_operand.vmem [shape: f32[4,8,32], index: 1, kind: input, shape index: {}, may-alias: {1,14}]   ;;  %s2035_s2 = inlined_call_operand.vmem [shape: f32[4,8,32], index: 2, kind: input, shape index: {}]   ;;  %s2036_s3 = inlined_call_operand.vmem [shape: bf16[32,32], index: 3, kind: input, shape index: {}]   ;;  %s2037_s4 = inlined_call_operand.vmem [shape: f32[1,32], index: 4, kind: input, shape index: {}]   ;;  %s2038_s5 = inlined_call_operand.vmem [shape: bf16[32,64], index: 5, kind: input, shape index: {}]   ;;  %s2039_s6 = inlined_call_operand.vmem [shape: f32[1,64], index: 6, kind: input, shape index: {}]   ;;  %s2040_s7 = inlined_call_operand.vmem [shape: bf16[32,32], index: 7, kind: input, shape index: {}]   ;;  %s2041_s8 = inlined_call_operand.vmem [shape: f32[1,32], index: 8, kind: input, shape index: {}]   ;;  %s2042_s9 = inlined_call_operand.vmem [shape: bf16[32,64], index: 9, kind: input, shape index: {}]   ;;  %s2043_s10 = inlined_call_operand.vmem [shape: bf16[32,64], index: 10, kind: input, shape index: {}]   ;;  %s2044_s11 = inlined_call_operand.vmem [shape: f32[1,64], index: 11, kind: input, shape index: {}]   ;;  %s2045_s12 = inlined_call_operand.vmem [shape: bf16[64,32], index: 12, kind: input, shape index: {}]   ;;  %s2046_s13 = inlined_call_operand.vmem [shape: f32[1,32], index: 13, kind: input, shape index: {}]   ;;  %s2047_s14 = inlined_call_operand.vmem [shape: f32[4,8,32], index: 14, kind: output, shape index: {}, may-alias: {1,14}]  }
   0x1   :  { %s19_s15 = sshll.u32 %s2033_s0, 4  ;;  %s20_s15 = int_to_ptr.vmem [resolvable:$true] %s19_s15 }
   0x2   :  { %s1736_s16 = scalar_lea.vmem %s20_s15, 16  ;;  %p1741_p1 = scmp.lt.s32.totalorder %s20_s15, %s20_s15 }
   0x3   :  { %p1737_p0 = scmp.ne.s32.totalorder %s20_s15, %s1736_s16  ;;  %p1742_p2 = scmp.lt.s32.totalorder %s1736_s16, %s1736_s16 }
   0x5   :  { %p1743_p3 = por %p1742_p2, %p1741_p1 }
   0x7   :  { %p1744_p4 = pnand %p1743_p3, %p1737_p0 }
   0x9   :  { %1747 = shalt.err (!%p1744_p4)  }
   0xa   :  { %s1758_s17 = smov [#allocation5]  }
   0xb   :  { %22 = dma.vmem_to_smem %s20_s15, 16, %s1758_s17, [#allocation4] }
   0xc   :  { %1752 = dma.done.wait [#allocation4], 16 }
   0xd   :  { %1753 = vsyncadd [#allocation4], 4294967280 }
   0xe   :  { %24 = sfence }
   0xf   :  { %s1849_s18 = smov 0  }
  0x10 LB: > { %s1482_s0 = sadd.s32 4294967295, %s1756_s18   ;;  %p1486_p5 = scmp.ge.s32.totalorder %s1756_s18, 1  ;;  %s1756_s18 = sphi %s1849_s18, %s30_s18  }
  0x11   : > { %p406_p6 = scmp.lt.s32.totalorder %s1756_s18, 5 }
  0x13   : > { %p407_p7 = pnand %p1486_p5, %p406_p6 }
  0x14   : > { %s457_s23 = sld [smem:[#allocation5 + %s1482_s0]] (!%p407_p7)  ;;  %p453_p8 = scmp.lt.s32.totalorder (!%p407_p7), %s1482_s0, 3 }
  0x15   : > { %410 = sbr.rel (%p407_p7) target bundleno = 1708 (0x6ac), region = 72  ;;  %s1761_s25 = smov (!%p407_p7), 112  }
  0x16   : > { %s1762_s26 = smov (!%p407_p7), 120   ;;  %s1763_s27 = smov (!%p407_p7), 104  }
  0x17   : > { %s1764_s29 = smov (!%p407_p7), 96   ;;  %s1765_s30 = smov (!%p407_p7), 80  }
  0x18   : > { %s1768_s17 = smov (!%p407_p7), 8  }
  0x1a   : > { %v1692_v0 = vld [vmem:[%s2038_s5 + $0x8] sm:$0xff]   ;;  %v1759_v1 = vmov 0.0   ;;  %v1693_v2 = vld [vmem:[%s2038_s5] sm:$0xff]   ;;  %vm1760_vm0 = vmmov 0   ;;  %s2049_s0 = smov (!%p453_p8, %s1482_s0), 3  ;;  %p458_p9 = scmp.lt.s32.totalorder %s457_s23, 3 }
  0x1b   : > { %1579 = vmatprep.subr.bf16.mxu1 %v1759_v1  ;;  %1571 = vmatprep.subr.bf16.mxu0 %v1759_v1  ;;  %v1694_v3 = vld [vmem:[%s2036_s3 + $0x8] sm:$0xff]   ;;  %v1695_v4 = vld [vmem:[%s2036_s3] sm:$0xff]   ;;  %s1487_s28 = sshll.u32 %s2049_s0, 3  ;;  %vm495_vm1 = vcmask 261120   ;;  %vm607_vm2 = vcmask 519168   ;;  %vm610_vm3 = vcmask 64512  }
  0x1c   : > { %1580 = vmatpush3.bf16.msra.mxu1 %v1692_v0  ;;  %1583 = vmatprep.mubr.msk.bf16.mxu1 %vm1760_vm0, %v1759_v1  ;;  %s456_s15 = scalar_lea.vmem %s2034_s1, %s1487_s28  ;;  %s2051_s23 = smov (!%p458_p9, %s457_s23), 3  ;;  %v1494_v11 = vld [vmem:[%s2039_s6] ss:$0 sm:$0xff]  ;;  %vm680_vm4 = vcmask 1043456   ;;  %vm728_vm5 = vcmask 60416   ;;  %vm858_vm6 = vcmask 126016  }
  0x1d   : > { %1581 = vmatprep.subr.bf16.mxu1 %v1759_v1  ;;  %1575 = vmatprep.mubr.msk.bf16.mxu0 %vm1760_vm0, %v1759_v1  ;;  %v1886_v5 = vld [vmem:[%s456_s15] sm:$0xff]  ;;  %s1488_s16 = sshll.u32 %s2051_s23, 3  ;;  %s1766_s15 = smov 72   ;;  %vm987_vm7 = vcmask 191616   ;;  %vm1116_vm8 = vcmask 257216   ;;  %vm1309_vm9 = vcmask 523264  }
  0x1e   : > { %1572 = vmatpush3.bf16.msra.mxu0 %v1694_v3  ;;  %v1890_v6 = vpack.c.bf16 %v1886_v5, %v1886_v5  ;;  %s461_s20 = scalar_lea.vmem %s2035_s2, %s1488_s16  ;;  %v1490_v20 = vld [vmem:[%s2037_s4] ss:$0 sm:$0xff]  ;;  %s1767_s16 = smov 88  }
  0x1f   : > { %1573 = vmatprep.subr.bf16.mxu0 %v1759_v1  ;;  %v470_v7 = vld [vmem:[%s461_s20] sm:$0xff]  ;;  %s1769_s23 = smov 16   ;;  %s466_s21 = scalar_lea.vmem %s2047_s14, %s1487_s28 }
  0x20   : > { %1582 = vmatpush3.bf16.msra.mxu1 %v1693_v2  ;;  %v471_v8 = vpack.c.bf16 %v470_v7, %v470_v7 }
  0x21   : > { %1593 = vmatprep.subr.bf16.mxu1 %v1759_v1 }
  0x22   : > { %1574 = vmatpush3.bf16.msra.mxu0 %v1695_v4 }
  0x23   : > { %1587 = vmatprep.subr.bf16.mxu0 %v1759_v1  ;;  %1584 = vmatmul.mubr.msk.bf16.vlgmr.msra.gmra.mxu1 %vm495_vm1, %v471_v8 }
  0x24   : > { %1595 = vmatprep.mubr.msk.bf16.mxu1 %vm1760_vm0, %v1759_v1 }
  0x25   : > { %1576 = vmatmul.mubr.msk.bf16.vlgmr.msra.gmra.mxu0 %vm495_vm1, %v1890_v6 }
  0x26   : > { %1589 = vmatprep.mubr.msk.bf16.mxu0 %vm1760_vm0, %v1759_v1 }
  0xe3   : > { %v600_v13 = vpop.f32.mrf.mxu1 }
  0xe4   : > { %v601_v14 = vadd.f32 %v1494_v11, %v600_v13 }
  0xe5   : > { %v533_v9 = vpop.f32.mrf.mxu0  ;;  %v1585_v16 = vpop.f32.mrf.mxu1 }
  0xe6   : > { %v606_v17 = vpack.c.bf16 %v601_v14, %v601_v14  ;;  %v534_v21 = vadd.f32 %v1490_v20, %v533_v9 }
  0xe7   : > { %v1577_v10 = vpop.f32.mrf.mxu0  ;;  %v603_v18 = vpop.f32.mrf.mxu1 }
  0xe8   : > { %608 = vst.msk [vmem:[#allocation2] sm:$0xf] %vm607_vm2, %v606_v17  ;;  %v539_v26 = vpack.c.bf16 %v534_v21, %v534_v21 }
  0xe9   : > { %v536_v12 = vpop.f32.mrf.mxu0  ;;  %v1586_v19 = vpop.f32.mrf.mxu1 }
  0xeb   : > { %v1578_v15 = vpop.f32.mrf.mxu0 }
  0xef   : > { %v609_v22 = vld [vmem:[#allocation2] sm:$0xf] }
  0xf0   : > { %v1909_v23 = vld [vmem:[#allocation2] ss:$0 sps:$4 sm:$0xff]   ;;  %v615_v24 = vsel %vm610_vm3, %v609_v22, 0  ;;  %v1499_v28 = vcombine.low %v609_v22, %v609_v22 }
  0xf1   : > { %v1912_v25 = vld [vmem:[#allocation2] ss:$0 sps:$4 sm:$0xff]   ;;  %1588 = vmatpush3.bf16.xpose.msra.mxu0 %v615_v24  ;;  %866 = vrot.lane.b32.xlu1 %v1909_v23, %s1761_s25 }
  0xf2   : > { %737 = vrot.lane.b32.xlu0 %v1912_v25, %s1762_s26  ;;  %1599 = vmatprep.subr.bf16.mxu0 %v1759_v1  ;;  %v1698_v27 = vld [vmem:[#allocation2] ss:$0 sps:$4 sm:$0xff]  }
  0xf5   : > { %861 = vrot.lane.b32.xlu1 %v539_v26, %s1761_s25 }
  0xf6   : > { %732 = vrot.lane.b32.xlu0 %v539_v26, %s1762_s26  ;;  %s1770_s26 = smov 24  }
  0xf8   : > { %1590 = vmatmul.mubr.msk.bf16.vlgmr.msra.gmra.mxu0 %vm610_vm3, %v539_v26 }
  0xf9   : > { %990 = vrot.lane.b32.xlu1 %v539_v26, %s1763_s27  ;;  %1601 = vmatprep.mubr.msk.bf16.mxu0 %vm1760_vm0, %v1759_v1 }
  0xfa   : > { %995 = vrot.lane.b32.xlu0 %v1698_v27, %s1763_s27 }
  0xfd   : > { %675 = vrot.lane.b32.xlu1 %v1499_v28, %s1764_s29 }
 0x163   : > { %v867_v29 = vpop.permute.xlu1 %866 }
 0x164   : > { %v738_v30 = vpop.permute.xlu0 %737  ;;  %v872_v35 = vsel %vm610_vm3, %v867_v29, 0 }
 0x165   : > { %v743_v31 = vsel %vm610_vm3, %v738_v30, 0 }
 0x166   : > { %1600 = vmatpush3.bf16.xpose.msra.mxu0 %v743_v31 }
 0x167   : > { %v862_v32 = vpop.permute.xlu1 %861  ;;  %1611 = vmatprep.subr.bf16.mxu0 %v1759_v1 }
 0x168   : > { %v733_v34 = vpop.permute.xlu0 %732 }
 0x16b   : > { %v991_v33 = vpop.permute.xlu1 %990 }
 0x16c   : > { %v996_v38 = vpop.permute.xlu0 %995 }
 0x16d   : > { %1602 = vmatmul.mubr.msk.bf16.vlgmr.msra.gmra.mxu0 %vm610_vm3, %v733_v34  ;;  %v1001_v39 = vsel %vm610_vm3, %v996_v38, 0 }
 0x16e   : > { %1612 = vmatpush3.bf16.xpose.msra.mxu0 %v872_v35  ;;  %1613 = vmatprep.mubr.msk.bf16.mxu0 %vm1760_vm0, %v1759_v1 }
 0x16f   : > { %v676_v36 = vpop.permute.xlu1 %675  ;;  %1623 = vmatprep.subr.bf16.mxu0 %v1759_v1 }
 0x170   : > { %v682_v37 = vsel %vm680_vm4, %v676_v36, 0 }
 0x171   : > { %1594 = vmatpush3.bf16.msra.mxu1 %v682_v37 }
 0x172   : > { %1605 = vmatprep.subr.bf16.mxu1 %v1759_v1 }
 0x175   : > { %1614 = vmatmul.mubr.msk.bf16.vlgmr.msra.gmra.mxu0 %vm610_vm3, %v862_v32 }
 0x176   : > { %1624 = vmatpush3.bf16.xpose.msra.mxu0 %v1001_v39  ;;  %1625 = vmatprep.mubr.msk.bf16.mxu0 %vm1760_vm0, %v1759_v1 }
 0x177   : > { %1635 = vmatprep.subr.bf16.mxu0 %v1759_v1 }
 0x17d   : > { %1626 = vmatmul.mubr.msk.bf16.vlgmr.msra.gmra.mxu0 %vm610_vm3, %v991_v33 }
 0x17e   : > { %1639 = vmatprep.mubr.msk.bf16.mxu0 %vm1760_vm0, %v1759_v1 }
 0x1b8   : > { %v651_v40 = vpop.f32.mrf.mxu0 }
 0x1b9   : > { %v657_v41 = vsel %vm610_vm3, %v651_v40, -inf }
 0x1ba   : > { %658 = vmax.xlane.f32.xlu0 %v657_v41  ;;  %v1591_v42 = vpop.f32.mrf.mxu0 }
 0x1bc   : > { %v654_v43 = vpop.f32.mrf.mxu0 }
 0x1be   : > { %v1592_v44 = vpop.f32.mrf.mxu0 }
 0x22d   : > { %v779_v45 = vpop.f32.mrf.mxu0 }
 0x22e   : > { %v785_v46 = vsel %vm610_vm3, %v779_v45, -inf }
 0x22f   : > { %786 = vmax.xlane.f32.xlu1 %v785_v46  ;;  %v1603_v47 = vpop.f32.mrf.mxu0 }
 0x231   : > { %v782_v48 = vpop.f32.mrf.mxu0 }
 0x233   : > { %v1604_v49 = vpop.f32.mrf.mxu0 }
 0x235   : > { %v908_v50 = vpop.f32.mrf.mxu0 }
 0x236   : > { %v914_v51 = vsel %vm610_vm3, %v908_v50, -inf }
 0x237   : > { %915 = vmax.xlane.f32.xlu0 %v914_v51  ;;  %v1615_v52 = vpop.f32.mrf.mxu0 }
 0x239   : > { %v911_v53 = vpop.f32.mrf.mxu0 }
 0x23b   : > { %v1616_v54 = vpop.f32.mrf.mxu0 }
 0x23d   : > { %v1037_v55 = vpop.f32.mrf.mxu0 }
 0x23e   : > { %v1043_v56 = vsel %vm610_vm3, %v1037_v55, -inf }
 0x23f   : > { %1044 = vmax.xlane.f32.xlu0 %v1043_v56  ;;  %v1627_v57 = vpop.f32.mrf.mxu0 }
 0x240   : > { %929 = vrot.lane.b32.xlu1 %v1909_v23, %s1765_s30 }
 0x241   : > { %v1040_v58 = vpop.f32.mrf.mxu0 }
 0x243   : > { %v659_v59 = vpop.xlane.xlu0 %658  ;;  %v1628_v60 = vpop.f32.mrf.mxu0 }
 0x244   : > { %v663_v61 = vsub.f32 %v651_v40, %v659_v59  ;;  %1058 = vrot.lane.b32.xlu1 %v1698_v27, %s1766_s15  ;;  %v660_v33 = vsub.f32 -inf, %v659_v59 }
 0x246   : > { %v664_v62 = vmul.f32 1.442695, %v663_v61  ;;  %v661_v34 = vmul.f32 1.442695, %v660_v33  ;;  %v1705_v33 = vld [vmem:[%s2043_s10] sm:$0xff]  }
 0x248   : > { %1710 = vpow2.f32 %v664_v62 }
 0x255   : > { %800 = vrot.lane.b32.xlu0 %v1912_v25, %s1767_s16  ;;  %v1711_v63 = vpop.eup %1710 }
 0x256   : > { %v666_v0 = vpack.c.bf16 %v1711_v63, %v1711_v63  ;;  %v668_v28 = vsel %vm610_vm3, %v1711_v63, 0.0 }
 0x258   : > { %1596 = vmatmul.mubr.msk.bf16.vlgmr.msra.gmra.mxu1 %vm610_vm3, %v666_v0 }
 0x259   : > { %1607 = vmatprep.mubr.msk.bf16.mxu1 %vm1760_vm0, %v1759_v1 }
 0x2b8   : > { %v787_v2 = vpop.xlane.xlu1 %786 }
 0x2b9   : > { %v791_v3 = vsub.f32 %v779_v45, %v787_v2  ;;  %v788_v38 = vsub.f32 -inf, %v787_v2 }
 0x2bb   : > { %v792_v4 = vmul.f32 1.442695, %v791_v3  ;;  %v789_v42 = vmul.f32 1.442695, %v788_v38 }
 0x2bc   : > { %v930_v17 = vpop.permute.xlu1 %929 }
 0x2bd   : > { %1712 = vpow2.f32 %v792_v4  ;;  %v935_v19 = vsel %vm680_vm4, %v930_v17, 0 }
 0x2c0   : > { %v916_v7 = vpop.xlane.xlu0 %915  ;;  %v1059_v22 = vpop.permute.xlu1 %1058 }
 0x2c1   : > { %v920_v8 = vsub.f32 %v908_v50, %v916_v7  ;;  %v1064_v24 = vsel %vm680_vm4, %v1059_v22, 0  ;;  %v917_v43 = vsub.f32 -inf, %v916_v7 }
 0x2c3   : > { %v921_v9 = vmul.f32 1.442695, %v920_v8  ;;  %v918_v44 = vmul.f32 1.442695, %v917_v43 }
 0x2c5   : > { %1714 = vpow2.f32 %v921_v9 }
 0x2c8   : > { %v1045_v10 = vpop.xlane.xlu0 %1044 }
 0x2c9   : > { %v1049_v11 = vsub.f32 %v1037_v55, %v1045_v10  ;;  %v1046_v45 = vsub.f32 -inf, %v1045_v10 }
 0x2ca   : > { %v1713_v12 = vpop.eup %1712 }
 0x2cb   : > { %v1050_v13 = vmul.f32 1.442695, %v1049_v11  ;;  %v796_v14 = vsel %vm610_vm3, %v1713_v12, 0.0  ;;  %v794_v18 = vpack.c.bf16 %v1713_v12, %v1713_v12  ;;  %v1047_v49 = vmul.f32 1.442695, %v1046_v45  ;;  %v1700_v12 = vld [vmem:[%s2040_s7 + $0x8] sm:$0xff]  }
 0x2cc   : > { %v801_v15 = vpop.permute.xlu0 %800  ;;  %797 = vadd.xlane.f32.xlu0 %v796_v14  ;;  %1636 = vmatpush3.bf16.msra.mxu0 %v1700_v12  ;;  %v1707_v45 = vld [vmem:[%s2045_s12 + $0x10] sm:$0xff]  }
 0x2cd   : > { %v806_v16 = vsel %vm680_vm4, %v801_v15, 0  ;;  %1716 = vpow2.f32 %v1050_v13  ;;  %v1701_v15 = vld [vmem:[%s2040_s7] sm:$0xff]   ;;  %1637 = vmatprep.subr.bf16.mxu0 %v1759_v1 }
 0x2ce   : > { %1606 = vmatpush3.bf16.msra.mxu1 %v806_v16  ;;  %1718 = vpow2.f32 %v661_v34  ;;  %v1513_v34 = vld [vmem:[%s2041_s8] ss:$0 sm:$0xff] }
 0x2cf   : > { %1617 = vmatprep.subr.bf16.mxu1 %v1759_v1 }
 0x2d0   : > { %1638 = vmatpush3.bf16.msra.mxu0 %v1701_v15 }
 0x2d1   : > { %1608 = vmatmul.mubr.msk.bf16.vlgmr.msra.gmra.mxu1 %vm610_vm3, %v794_v18  ;;  %1651 = vmatprep.subr.bf16.mxu0 %v1759_v1 }
 0x2d2   : > { %1618 = vmatpush3.bf16.msra.mxu1 %v935_v19  ;;  %1619 = vmatprep.mubr.msk.bf16.mxu1 %vm1760_vm0, %v1759_v1  ;;  %v1715_v20 = vpop.eup %1714 }
 0x2d3   : > { %1629 = vmatprep.subr.bf16.mxu1 %v1759_v1  ;;  %v925_v21 = vsel %vm610_vm3, %v1715_v20, 0.0  ;;  %v923_v23 = vpack.c.bf16 %v1715_v20, %v1715_v20 }
 0x2d4   : > { %926 = vadd.xlane.f32.xlu1 %v925_v21 }
 0x2d9   : > { %1620 = vmatmul.mubr.msk.bf16.vlgmr.msra.gmra.mxu1 %vm610_vm3, %v923_v23  ;;  %v1703_v23 = vld [vmem:[%s2043_s10 + $0x8] sm:$0xff]  }
 0x2da   : > { %1630 = vmatpush3.bf16.msra.mxu1 %v1064_v24  ;;  %1631 = vmatprep.mubr.msk.bf16.mxu1 %vm1760_vm0, %v1759_v1  ;;  %v1717_v25 = vpop.eup %1716 }
 0x2db   : > { %1643 = vmatprep.subr.bf16.mxu1 %v1759_v1  ;;  %v1054_v26 = vsel %vm610_vm3, %v1717_v25, 0.0  ;;  %v1052_v27 = vpack.c.bf16 %v1717_v25, %v1717_v25  ;;  %v1719_v36 = vpop.eup %1718 }
 0x2dc   : > { %1055 = vadd.xlane.f32.xlu0 %v1054_v26  ;;  %v667_v39 = vmul.f32 0.0, %v1719_v36 }
 0x2e0   : > { %669 = vadd.xlane.f32.xlu0 %v668_v28 }
 0x2e1   : > { %1632 = vmatmul.mubr.msk.bf16.vlgmr.msra.gmra.mxu1 %vm610_vm3, %v1052_v27 }
 0x2e2   : > { %1647 = vmatprep.mubr.msk.bf16.mxu1 %vm1760_vm0, %v1759_v1  ;;  %1644 = vmatpush3.bf16.msra.mxu1 %v1703_v23 }
 0x2e3   : > { %1645 = vmatprep.subr.bf16.mxu1 %v1759_v1 }
 0x2e6   : > { %1646 = vmatpush3.bf16.msra.mxu1 %v1705_v33 }
 0x2e7   : > { %1659 = vmatprep.subr.bf16.mxu1 %v1759_v1 }
 0x318   : > { %v718_v29 = vpop.f32.mrf.mxu1 }
 0x319   : > { %v724_v46 = vadd.f32 %v718_v29, %v667_v39 }
 0x31a   : > { %v1597_v30 = vpop.f32.mrf.mxu1 }
 0x31b   : > { %v1702_v30 = vld [vmem:[%s2042_s9 + $0x8] sm:$0xff]  }
 0x31c   : > { %v721_v31 = vpop.f32.mrf.mxu1 }
 0x31e   : > { %v1598_v32 = vpop.f32.mrf.mxu1 }
 0x31f   : > { %v1704_v32 = vld [vmem:[%s2042_s9] sm:$0xff]  }
 0x355   : > { %v798_v35 = vpop.xlane.xlu0 %797 }
 0x35d   : > { %v927_v55 = vpop.xlane.xlu1 %926 }
 0x365   : > { %v1056_v37 = vpop.xlane.xlu0 %1055 }
 0x369   : > { %v670_v40 = vpop.xlane.xlu0 %669 }
 0x36a   : > { %v671_v41 = vadd.f32 %v670_v40, %v667_v39 }
 0x36c   : > { %1720 = vrcp.f32 %v671_v41 }
 0x36d   : > { %1722 = vpow2.f32 %v789_v42 }
 0x36e   : > { %1724 = vpow2.f32 %v918_v44  ;;  %v1706_v44 = vld [vmem:[%s2045_s12 + $0x18] sm:$0xff]  }
 0x36f   : > { %1726 = vpow2.f32 %v1047_v49  ;;  %v1523_v49 = vld [vmem:[%s2044_s11] ss:$0 sm:$0xff] }
 0x379   : > { %v1721_v47 = vpop.eup %1720 }
 0x37a   : > { %v726_v48 = vmul.f32 %v1721_v47, %v724_v46  ;;  %v1723_v50 = vpop.eup %1722  ;;  %v1708_v46 = vld [vmem:[%s2045_s12 + $0x8] sm:$0xff]   ;;  %v1709_v47 = vld [vmem:[%s2045_s12] sm:$0xff]  }
 0x37b   : > { %v795_v52 = vmul.f32 0.0, %v1723_v50  ;;  %v1725_v54 = vpop.eup %1724 }
 0x37c   : > { %v727_v51 = vpack.c.bf16 %v726_v48, %v726_v48  ;;  %v924_v56 = vmul.f32 0.0, %v1725_v54  ;;  %v1727_v58 = vpop.eup %1726 }
 0x37d   : > { %v799_v53 = vadd.f32 %v798_v35, %v795_v52  ;;  %v1053_v59 = vmul.f32 0.0, %v1727_v58 }
 0x37e   : > { %729 = vst.msk [vmem:[#allocation3] sm:$0xf] %vm728_vm5, %v727_v51  ;;  %v928_v57 = vadd.f32 %v927_v55, %v924_v56 }
 0x37f   : > { %1728 = vrcp.f32 %v799_v53  ;;  %v1057_v61 = vadd.f32 %v1056_v37, %v1053_v59 }
 0x380   : > { %1730 = vrcp.f32 %v928_v57 }
 0x381   : > { %1732 = vrcp.f32 %v1057_v61 }
 0x38c   : > { %v1729_v63 = vpop.eup %1728 }
 0x38d   : > { %v1731_v10 = vpop.eup %1730 }
 0x38e   : > { %v1733_v20 = vpop.eup %1732 }
 0x391   : > { %v842_v60 = vpop.f32.mrf.mxu1 }
 0x392   : > { %v848_v62 = vadd.f32 %v842_v60, %v795_v52 }
 0x393   : > { %v1609_v0 = vpop.f32.mrf.mxu1 }
 0x394   : > { %v850_v2 = vmul.f32 %v1729_v63, %v848_v62 }
 0x395   : > { %v845_v3 = vpop.f32.mrf.mxu1 }
 0x396   : > { %v1532_v4 = vpack.c.bf16 %v850_v2, %v850_v2 }
 0x397   : > { %v1610_v7 = vpop.f32.mrf.mxu1 }
 0x398   : > { %855 = vrot.lane.b32.xlu1 %v1532_v4, %s1768_s17 }
 0x399   : > { %v971_v8 = vpop.f32.mrf.mxu1 }
 0x39a   : > { %v977_v9 = vadd.f32 %v971_v8, %v924_v56 }
 0x39b   : > { %v1621_v11 = vpop.f32.mrf.mxu1 }
 0x39c   : > { %v979_v13 = vmul.f32 %v1731_v10, %v977_v9 }
 0x39d   : > { %v974_v14 = vpop.f32.mrf.mxu1 }
 0x39e   : > { %v1533_v16 = vpack.c.bf16 %v979_v13, %v979_v13 }
 0x39f   : > { %v1622_v17 = vpop.f32.mrf.mxu1 }
 0x3a0   : > { %984 = vrot.lane.b32.xlu0 %v1533_v16, %s1769_s23  ;;  %v1524_v16 = vld [vmem:[%s2046_s13] ss:$0 sm:$0xff] }
 0x3a1   : > { %v1100_v18 = vpop.f32.mrf.mxu1 }
 0x3a2   : > { %v1106_v19 = vadd.f32 %v1100_v18, %v1053_v59 }
 0x3a3   : > { %v1633_v21 = vpop.f32.mrf.mxu1 }
 0x3a4   : > { %v1108_v22 = vmul.f32 %v1733_v20, %v1106_v19 }
 0x3a5   : > { %v1103_v24 = vpop.f32.mrf.mxu1 }
 0x3a6   : > { %v1534_v25 = vpack.c.bf16 %v1108_v22, %v1108_v22 }
 0x3a7   : > { %v1634_v26 = vpop.f32.mrf.mxu1 }
 0x3a8   : > { %1113 = vrot.lane.b32.xlu1 %v1534_v25, %s1770_s26 }
 0x40a   : > { %v856_v27 = vpop.permute.xlu1 %855 }
 0x40b   : > { %859 = vst.msk [vmem:[#allocation3] sm:$0xf] %vm858_vm6, %v856_v27 }
 0x412   : > { %v985_v28 = vpop.permute.xlu0 %984 }
 0x413   : > { %988 = vst.msk [vmem:[#allocation3] sm:$0xf] %vm987_vm7, %v985_v28 }
 0x41a   : > { %v1114_v29 = vpop.permute.xlu1 %1113 }
 0x41b   : > { %1117 = vst.msk [vmem:[#allocation3] sm:$0xf] %vm1116_vm8, %v1114_v29 }
 0x422   : > { %v1118_v31 = vld [vmem:[#allocation3] sm:$0xf] }
 0x423   : > { %1640 = vmatmul.mubr.msk.bf16.vlgmr.msra.gmra.mxu0 %vm495_vm1, %v1118_v31 }
 0x424   : > { %1652 = vmatpush3.bf16.msra.mxu0 %v1702_v30  ;;  %1655 = vmatprep.mubr.msk.bf16.mxu0 %vm1760_vm0, %v1759_v1 }
 0x425   : > { %1653 = vmatprep.subr.bf16.mxu0 %v1759_v1 }
 0x428   : > { %1654 = vmatpush3.bf16.msra.mxu0 %v1704_v32 }
 0x42b   : > { %1656 = vmatmul.mubr.msk.bf16.vlgmr.msra.gmra.mxu0 %vm495_vm1, %v1890_v6 }
 0x4e3   : > { %v1179_v35 = vpop.f32.mrf.mxu0 }
 0x4e4   : > { %v1180_v36 = vadd.f32 %v1513_v34, %v1179_v35 }
 0x4e5   : > { %v1641_v37 = vpop.f32.mrf.mxu0 }
 0x4e6   : > { %v1189_v38 = vpack.c.bf16 %v1180_v36, %v1180_v36 }
 0x4e7   : > { %v1182_v39 = vpop.f32.mrf.mxu0 }
 0x4e8   : > { %1648 = vmatmul.mubr.msk.bf16.vlgmr.msra.gmra.mxu1 %vm495_vm1, %v1189_v38 }
 0x4e9   : > { %v1642_v40 = vpop.f32.mrf.mxu0  ;;  %1667 = vmatprep.mubr.msk.bf16.mxu1 %vm1760_vm0, %v1759_v1  ;;  %1660 = vmatpush3.bf16.msra.mxu1 %v1706_v44 }
 0x4ea   : > { %1661 = vmatprep.subr.bf16.mxu1 %v1759_v1 }
 0x4eb   : > { %v1295_v6 = vpop.f32.mrf.mxu0 }
 0x4ed   : > { %v1657_v41 = vpop.f32.mrf.mxu0  ;;  %1662 = vmatpush3.bf16.msra.mxu1 %v1707_v45 }
 0x4ee   : > { %1663 = vmatprep.subr.bf16.mxu1 %v1759_v1 }
 0x4ef   : > { %v1298_v42 = vpop.f32.mrf.mxu0 }
 0x4f1   : > { %v1658_v43 = vpop.f32.mrf.mxu0  ;;  %1664 = vmatpush3.bf16.msra.mxu1 %v1708_v46 }
 0x4f2   : > { %1665 = vmatprep.subr.bf16.mxu1 %v1759_v1 }
 0x4f5   : > { %1666 = vmatpush3.bf16.msra.mxu1 %v1709_v47 }
 0x5a8   : > { %v1243_v48 = vpop.f32.mrf.mxu1 }
 0x5a9   : > { %v1296_v50 = vadd.f32 %v1295_v6, %v1243_v48 }
 0x5aa   : > { %v1649_v51 = vpop.f32.mrf.mxu1 }
 0x5ab   : > { %v1308_v52 = vadd.f32 %v1523_v49, %v1296_v50 }
 0x5ac   : > { %v1246_v53 = vpop.f32.mrf.mxu1 }
 0x5ad   : > { %v1310_v54 = vsel %vm1309_vm9, %v1308_v52, 0.0 }
 0x5ae   : > { %v1311_v55 = vrot.slane %v1310_v54, 4  ;;  %v1650_v56 = vpop.f32.mrf.mxu1 }
 0x5b0   : > { %v1312_v1 = vadd.f32 %v1311_v55, %v1310_v54 }
 0x5b2   : > { %v1313_v57 = vrot.slane %v1312_v1, 2 }
 0x5b4   : > { %v1314_v58 = vadd.f32 %v1313_v57, %v1312_v1 }
 0x5b6   : > { %v1315_v59 = vrot.slane %v1314_v58, 1 }
 0x5b8   : > { %v1316_v60 = vadd.f32 %v1315_v59, %v1314_v58 }
 0x5ba   : > { %v1317_v61 = vmul.f32 0.125, %v1316_v60 }
 0x5bc   : > { %v1318_v62 = vsub.f32 %v1308_v52, %v1317_v61 }
 0x5be   : > { %v1319_v63 = vmul.f32 %v1318_v62, %v1318_v62 }
 0x5c0   : > { %v1320_v0 = vsel %vm1309_vm9, %v1319_v63, 0.0 }
 0x5c1   : > { %v1321_v2 = vrot.slane %v1320_v0, 4 }
 0x5c3   : > { %v1322_v3 = vadd.f32 %v1321_v2, %v1320_v0 }
 0x5c5   : > { %v1323_v4 = vrot.slane %v1322_v3, 2 }
 0x5c7   : > { %v1324_v7 = vadd.f32 %v1323_v4, %v1322_v3 }
 0x5c9   : > { %v1325_v8 = vrot.slane %v1324_v7, 1 }
 0x5cb   : > { %v1326_v9 = vadd.f32 %v1325_v8, %v1324_v7 }
 0x5cd   : > { %v1327_v10 = vmul.f32 0.125, %v1326_v9 }
 0x5cf   : > { %v1328_v11 = vadd.f32 1e-05, %v1327_v10 }
 0x5d1   : > { %1734 = vrsqrt.f32 %v1328_v11 }
 0x5de   : > { %v1735_v12 = vpop.eup %1734 }
 0x5df   : > { %v1330_v13 = vmul.f32 %v1735_v12, %v1318_v62 }
 0x5e1   : > { %v1331_v14 = vmax.f32 %v1330_v13, 0.0 }
 0x5e3   : > { %v1332_v15 = vpack.c.bf16 %v1331_v14, %v1331_v14 }
 0x5e5   : > { %1668 = vmatmul.mubr.msk.bf16.vlgmr.msra.gmra.mxu1 %vm1309_vm9, %v1332_v15 }
 0x6a5   : > { %v1409_v17 = vpop.f32.mrf.mxu1 }
 0x6a6   : > { %v1410_v18 = vadd.f32 %v1524_v16, %v1409_v17 }
 0x6a7   : > { %v1669_v19 = vpop.f32.mrf.mxu1 }
 0x6a8   : > { %v1415_v20 = vadd.f32 %v1410_v18, %v1886_v5 }
 0x6a9   : > { %v1412_v21 = vpop.f32.mrf.mxu1 }
 0x6aa   : > { %1416 = vst.msk [vmem:[%s466_s21] sm:$0xff] %vm495_vm1, %v1415_v20 }
 0x6ab   : > { %v1670_v22 = vpop.f32.mrf.mxu1 }
 0x6ac PF: > { %s30_s18 = sadd.s32 1, %s1756_s18  }
 0x6ad   : > { %p27_p10 = scmp.ge.s32.totalorder %s30_s18, 6  }
 0x6af   :  { %29 = sbr.rel (!%p27_p10) target bundleno = 16 (0x10), region = 105 }

</bundles_post_ra>
